<compile_context>
chip_gen: v6e
topology: v6e:2x2x1
jax: 0.10.0
libtpu: 0.0.40
codegen_flags: <defaults>
</compile_context>

<pallas_src>
import functools
import math

import jax
import jax.numpy as jnp
from jax import lax
from jax.experimental import pallas as pl
from jax.experimental.pallas import tpu as pltpu

VMEM_SPEC = pl.BlockSpec(memory_space=pltpu.MemorySpace.VMEM)


def _round_up(x, m):
    return ((x + m - 1) // m) * m


def _gelu(x):
    # tanh approximation of GELU
    return 0.5 * x * (1.0 + jnp.tanh(0.7978845608028654 * (x + 0.044715 * x * x * x)))


# --------------------------------------------------------------------------
# Tiled matmul + fused bias/activation epilogue
# --------------------------------------------------------------------------
def _mm_kernel(x_ref, w_ref, b_ref, o_ref, acc_ref, *, act, k_steps):
    @pl.when(pl.program_id(2) == 0)
    def _init():
        acc_ref[...] = jnp.zeros_like(acc_ref)

    acc_ref[...] += jnp.dot(x_ref[...], w_ref[...], preferred_element_type=jnp.float32)

    @pl.when(pl.program_id(2) == k_steps - 1)
    def _finalize():
        y = acc_ref[...] + b_ref[...].astype(jnp.float32)
        if act == "gelu":
            y = _gelu(y)
        elif act == "relu":
            y = jnp.maximum(y, 0.0)
        elif act == "tanh":
            y = jnp.tanh(y)
        elif act == "sigmoid":
            y = jax.nn.sigmoid(y)
        o_ref[...] = y.astype(o_ref.dtype)


def mm_bias_act(x, w, b, act="none", compute_dtype=None):
    """y = act(x @ w + b); x:(M,K) w:(K,N) b:(N,). Tiled, pipelined, fused epilogue."""
    M, K = x.shape
    K2, N = w.shape
    assert K == K2

    if compute_dtype is not None:
        x = x.astype(compute_dtype)
        w = w.astype(compute_dtype)

    tm = min(256, _round_up(M, 8))
    tn = min(256, _round_up(N, 128))
    tk = min(512, _round_up(K, 128))
    Mp, Kp, Np = _round_up(M, tm), _round_up(K, tk), _round_up(N, tn)

    if (Mp, Kp) != (M, K):
        x = jnp.pad(x, ((0, Mp - M), (0, Kp - K)))
    if (Kp, Np) != (K, N):
        w = jnp.pad(w, ((0, Kp - K), (0, Np - N)))
    b2 = jnp.pad(b.reshape(1, N).astype(jnp.float32), ((0, 0), (0, Np - N)))

    k_steps = Kp // tk
    out = pl.pallas_call(
        functools.partial(_mm_kernel, act=act, k_steps=k_steps),
        grid=(Mp // tm, Np // tn, k_steps),
        in_specs=[
            pl.BlockSpec((tm, tk), lambda i, j, k: (i, k)),
            pl.BlockSpec((tk, tn), lambda i, j, k: (k, j)),
            pl.BlockSpec((1, tn), lambda i, j, k: (0, j)),
        ],
        out_specs=pl.BlockSpec((tm, tn), lambda i, j, k: (i, j)),
        out_shape=jax.ShapeDtypeStruct((Mp, Np), jnp.float32),
        scratch_shapes=[pltpu.VMEM((tm, tn), jnp.float32)],
        compiler_params=pltpu.CompilerParams(
            dimension_semantics=("parallel", "parallel", "arbitrary")),
    )(x, w, b2)
    return out[:M, :N]


# --------------------------------------------------------------------------
# Fused bidirectional GRU (both directions in one kernel)
# --------------------------------------------------------------------------
def _bigru_kernel(gx_ref, whh_ref, bhh_ref, out_ref):
    """Both directions packed on the feature axis.
    gx:(T,B,6H) columns ordered [r_f,r_b,z_f,z_b,n_f,n_b];
    whh:(2H,6H) block-diagonal; bhh:(1,6H); out:(T,B,2H) = [h_f, h_b]."""
    T = gx_ref.shape[0]
    B = gx_ref.shape[1]
    H2 = out_ref.shape[2]  # 2H

    def step(t, h):
        gx = gx_ref[t]                                                  # (B, 6H)
        gh = jnp.dot(h, whh_ref[...], preferred_element_type=jnp.float32) + bhh_ref[...]
        r = jax.nn.sigmoid(gx[:, 0:H2] + gh[:, 0:H2])
        z = jax.nn.sigmoid(gx[:, H2:2 * H2] + gh[:, H2:2 * H2])
        n = jnp.tanh(gx[:, 2 * H2:3 * H2] + r * gh[:, 2 * H2:3 * H2])
        h_new = (1.0 - z) * n + z * h
        out_ref[t] = h_new
        return h_new

    lax.fori_loop(0, T, step, jnp.zeros((B, H2), jnp.float32))


def fuse_bigru_weights(fwd, bwd, H):
    """Fuse PyTorch-layout per-direction GRU weights into the packed layout."""
    def gcols(wt):  # (In, 3H) -> per-gate (In, H) blocks, gate order r,z,n
        return [wt[:, g * H:(g + 1) * H] for g in range(3)]

    def bcols(bv):
        return [bv[g * H:(g + 1) * H] for g in range(3)]

    wf, wb = gcols(fwd["wih"].T), gcols(bwd["wih"].T)
    w_in = jnp.concatenate([wf[0], wb[0], wf[1], wb[1], wf[2], wb[2]], axis=1)   # (In, 6H)
    bf, bb = bcols(fwd["bih"]), bcols(bwd["bih"])
    b_in = jnp.concatenate([bf[0], bb[0], bf[1], bb[1], bf[2], bb[2]])

    hf, hb = gcols(fwd["whh"].T), gcols(bwd["whh"].T)                            # (H, H) each
    zeros = jnp.zeros((H, H), jnp.float32)
    row_f = jnp.concatenate([hf[0], zeros, hf[1], zeros, hf[2], zeros], axis=1)
    row_b = jnp.concatenate([zeros, hb[0], zeros, hb[1], zeros, hb[2]], axis=1)
    w_hh = jnp.concatenate([row_f, row_b], axis=0)                               # (2H, 6H)
    bhf, bhb = bcols(fwd["bhh"]), bcols(bwd["bhh"])
    b_hh = jnp.concatenate([bhf[0], bhb[0], bhf[1], bhb[1], bhf[2], bhb[2]])
    return {"w_in": w_in, "b_in": b_in, "w_hh": w_hh, "b_hh": b_hh}


def bigru_layer(x, p):
    """x: (B, T, In) -> (B, T, 2H). One fused gate matmul + one recurrence kernel."""
    B, T, In = x.shape
    H2 = p["w_hh"].shape[0]
    H = H2 // 2

    # Fused input-gate projection for both directions (N = 6H, lane-dense).
    gx = mm_bias_act(x.reshape(B * T, In), p["w_in"], p["b_in"],
                     compute_dtype=jnp.bfloat16 if In >= 256 else None)
    gx = gx.reshape(B, T, 3, 2, H)              # (gate r/z/n, direction f/b, H)
    gx_f = gx[:, :, :, 0]                       # forward-time gates
    gx_b = gx[:, :, :, 1][:, ::-1]              # backward gates, scan order
    gates = jnp.stack([gx_f, gx_b], axis=3).reshape(B, T, 6 * H).transpose(1, 0, 2)

    out = pl.pallas_call(
        _bigru_kernel,
        out_shape=jax.ShapeDtypeStruct((T, B, H2), jnp.float32),
        in_specs=[VMEM_SPEC, VMEM_SPEC, VMEM_SPEC],
        out_specs=VMEM_SPEC,
    )(gates, p["w_hh"], p["b_hh"].reshape(1, 3 * H2))

    h_f = out[:, :, :H]                         # already in original time order
    h_b = out[::-1, :, H:]                      # undo time reversal
    return jnp.concatenate([h_f, h_b], axis=-1).transpose(1, 0, 2)   # (B, T, 2H)


def bigru(x, layers):
    # Dropout between stacked GRU layers is identity in eval mode.
    for p in layers:
        x = bigru_layer(x, p)
    return x


# --------------------------------------------------------------------------
# ResNet stand-in + linear head
# --------------------------------------------------------------------------
def resnet_stub(p, x):
    """x: (N, 3, H, W) -> (N, 1000).
    TODO(synk): pretrained resnet18 cannot be loaded; replaced by
    conv3x3(s2)+ReLU + global avg pool + FC->1000 deterministic stand-in."""
    N, C, H, W = x.shape
    KH = KW = 3
    stride, pad = 2, 1
    Ho = (H + 2 * pad - KH) // stride + 1
    Wo = (W + 2 * pad - KW) // stride + 1

    # Patch extraction with static strided slices (no gather-based im2col).
    xp = jnp.pad(x, ((0, 0), (0, 0), (pad, pad), (pad, pad)))
    cols = [xp[:, :, dh:dh + stride * Ho:stride, dw:dw + stride * Wo:stride]
            for dh in range(KH) for dw in range(KW)]
    patches = jnp.stack(cols, axis=-1)                          # (N, C, Ho, Wo, K*K)
    pm = patches.transpose(0, 2, 3, 1, 4).reshape(N * Ho * Wo, C * KH * KW)

    y = mm_bias_act(pm, p["conv_w"], p["conv_b"], act="relu")   # conv-as-GEMM + fused ReLU
    y = y.reshape(N, Ho * Wo, -1).mean(axis=1)                  # global average pool
    return mm_bias_act(y, p["fc_w"], p["fc_b"])                 # (N, 1000)


def resnet_model_forward(P, x):
    """x: (B, S, 3, H, W) -> (B, S, out_dim)."""
    B, S, C, H, W = x.shape
    feat = resnet_stub(P["resnet"], x.reshape(B * S, C, H, W))  # (B*S, 1000)
    feat = feat.reshape(B, S, -1)
    g = bigru(feat, P["gru_layers"])                            # (B, S, 2*out_dim)
    Bv, T, D2 = g.shape
    # Linear(2*out_dim -> out_dim) + GELU + Dropout(identity), fused epilogue.
    y = mm_bias_act(g.reshape(Bv * T, D2), P["lin_w"], P["lin_b"], act="gelu")
    return y.reshape(Bv, T, -1)


# --------------------------------------------------------------------------
# Deterministic parameter init
# --------------------------------------------------------------------------
class KeyGen:
    def __init__(self, key):
        self.key = key

    def __call__(self):
        self.key, sub = jax.random.split(self.key)
        return sub


def init_params(key, out_dim=32, n_gru=1, resnet_out=1000, conv_ch=64):
    kg = KeyGen(key)

    def nrm(shape, scale=0.02):
        return jax.random.normal(kg(), shape, jnp.float32) * scale

    def dense(din, dout):
        return nrm((din, dout), 1.0 / math.sqrt(din)), nrm((dout,), 0.02)

    def gru_dir(in_dim, Hd):
        # PyTorch layout: W_ih:(3H, In), W_hh:(3H, H), gate order (r, z, n).
        return {"wih": nrm((3 * Hd, in_dim), 1.0 / math.sqrt(in_dim)),
                "bih": nrm((3 * Hd,), 0.02),
                "whh": nrm((3 * Hd, Hd), 1.0 / math.sqrt(Hd)),
                "bhh": nrm((3 * Hd,), 0.02)}

    conv_w, conv_b = dense(3 * 3 * 3, conv_ch)
    fc_w, fc_b = dense(conv_ch, resnet_out)

    gru_layers = []
    in_dim = resnet_out
    for _ in range(n_gru):
        fwd = gru_dir(in_dim, out_dim)
        bwd = gru_dir(in_dim, out_dim)
        gru_layers.append(fuse_bigru_weights(fwd, bwd, out_dim))
        in_dim = 2 * out_dim

    lin_w, lin_b = dense(2 * out_dim, out_dim)

    return {
        "resnet": {"conv_w": conv_w, "conv_b": conv_b, "fc_w": fc_w, "fc_b": fc_b},
        "gru_layers": gru_layers,
        "lin_w": lin_w, "lin_b": lin_b,
    }


# --------------------------------------------------------------------------
if __name__ == "__main__":
    B, S, C, H, W = 2, 8, 3, 16, 16
    OUT_DIM, N_GRU = 32, 1

    kd = KeyGen(jax.random.PRNGKey(0))
    x = jax.random.normal(kd(), (B, S, C, H, W), jnp.float32)

    params = init_params(jax.random.PRNGKey(42), out_dim=OUT_DIM, n_gru=N_GRU)

    fwd = jax.jit(resnet_model_forward)
    out = fwd(params, x)
    jax.block_until_ready(out)
    assert out.shape == (B, S, OUT_DIM), out.shape
    assert bool(jnp.all(jnp.isfinite(out)))
    print("KERNEL_OK")
</pallas_src>

<mosaic_0001>
module attributes {stable_mosaic.version = 11 : i64} {
  func.func @_mm_kernel(%arg0: i32, %arg1: i32, %arg2: i32, %arg3: memref<256x128xf32, #tpu.memory_space<vmem>>, %arg4: memref<128x128xf32, #tpu.memory_space<vmem>>, %arg5: memref<1x128xf32, #tpu.memory_space<vmem>>, %arg6: memref<256x128xf32, #tpu.memory_space<vmem>>, %arg7: memref<256x128xf32, #tpu.memory_space<vmem>>) attributes {dimension_semantics = [#tpu.dimension_semantics<parallel>, #tpu.dimension_semantics<parallel>, #tpu.dimension_semantics<arbitrary>], iteration_bounds = array<i64: 4, 1, 1>, scalar_prefetch = 0 : i64, scratch_operands = 1 : i64, tpu.core_type = #tpu.core_type<tc>, window_params = [{transform_indices = @transform_0, window_bounds = array<i64: 256, 128>}, {transform_indices = @transform_1, window_bounds = array<i64: 128, 128>}, {transform_indices = @transform_2, window_bounds = array<i64: 1, 128>}, {transform_indices = @transform_3, window_bounds = array<i64: 256, 128>}]} {
    %c0_i32 = arith.constant 0 : i32
    %0 = arith.cmpi eq, %arg2, %c0_i32 : i32
    %1 = arith.extui %0 : i1 to i32
    %c0_i32_0 = arith.constant 0 : i32
    %2 = arith.cmpi ne, %1, %c0_i32_0 : i32
    scf.if %2 {
      %cst_10 = arith.constant 0.000000e+00 : f32
      %12 = vector.broadcast %cst_10 : f32 to vector<256x128xf32>
      %c0_11 = arith.constant 0 : index
      %c0_12 = arith.constant 0 : index
      %13 = vector.load %arg7[%c0_11, %c0_12] : memref<256x128xf32, #tpu.memory_space<vmem>>, vector<256x128xf32>
      tpu.vector_store %arg7[%c0_11, %c0_12], %12 {strides = array<i32>} : memref<256x128xf32, #tpu.memory_space<vmem>>, vector<256x128xf32>,
    } else {
    }
    %c0 = arith.constant 0 : index
    %c0_1 = arith.constant 0 : index
    %3 = vector.load %arg7[%c0, %c0_1] : memref<256x128xf32, #tpu.memory_space<vmem>>, vector<256x128xf32>
    %c0_2 = arith.constant 0 : index
    %c0_3 = arith.constant 0 : index
    %4 = vector.load %arg3[%c0_2, %c0_3] : memref<256x128xf32, #tpu.memory_space<vmem>>, vector<256x128xf32>
    %c0_4 = arith.constant 0 : index
    %c0_5 = arith.constant 0 : index
    %5 = vector.load %arg4[%c0_4, %c0_5] : memref<128x128xf32, #tpu.memory_space<vmem>>, vector<128x128xf32>
    %cst = arith.constant dense<0.000000e+00> : vector<256x128xf32>
    %6 = tpu.matmul %4, %5, %cst {dimension_numbers = #tpu.dot_dimension_numbers<[1], [0], [0], [1], [0, 0, 1, 1], [], []>} : vector<256x128xf32>, vector<128x128xf32>, vector<256x128xf32> -> vector<256x128xf32>
    %7 = arith.addf %3, %6 : vector<256x128xf32>
    %c0_6 = arith.constant 0 : index
    %c0_7 = arith.constant 0 : index
    %8 = vector.load %arg7[%c0_6, %c0_7] : memref<256x128xf32, #tpu.memory_space<vmem>>, vector<256x128xf32>
    tpu.vector_store %arg7[%c0_6, %c0_7], %7 {strides = array<i32>} : memref<256x128xf32, #tpu.memory_space<vmem>>, vector<256x128xf32>,
    %c0_i32_8 = arith.constant 0 : i32
    %9 = arith.cmpi eq, %arg2, %c0_i32_8 : i32
    %10 = arith.extui %9 : i1 to i32
    %c0_i32_9 = arith.constant 0 : i32
    %11 = arith.cmpi ne, %10, %c0_i32_9 : i32
    scf.if %11 {
      %c0_10 = arith.constant 0 : index
      %c0_11 = arith.constant 0 : index
      %12 = vector.load %arg7[%c0_10, %c0_11] : memref<256x128xf32, #tpu.memory_space<vmem>>, vector<256x128xf32>
      %c0_12 = arith.constant 0 : index
      %c0_13 = arith.constant 0 : index
      %13 = vector.load %arg5[%c0_12, %c0_13] : memref<1x128xf32, #tpu.memory_space<vmem>>, vector<1x128xf32>
      %14 = vector.broadcast %13 : vector<1x128xf32> to vector<256x128xf32>
      %15 = arith.addf %12, %14 : vector<256x128xf32>
      %cst_14 = arith.constant 0.000000e+00 : f32
      %16 = vector.broadcast %cst_14 : f32 to vector<256x128xf32>
      %17 = arith.maximumf %15, %16 : vector<256x128xf32>
      %c0_15 = arith.constant 0 : index
      %c0_16 = arith.constant 0 : index
      %18 = vector.load %arg6[%c0_15, %c0_16] : memref<256x128xf32, #tpu.memory_space<vmem>>, vector<256x128xf32>
      tpu.vector_store %arg6[%c0_15, %c0_16], %17 {strides = array<i32>} : memref<256x128xf32, #tpu.memory_space<vmem>>, vector<256x128xf32>,
    } else {
    }
    return
  }
  func.func @transform_0(%arg0: i32, %arg1: i32, %arg2: i32) -> (i32, i32) {
    %c0_i32 = arith.constant 0 : i32
    return %arg0, %arg2 : i32, i32
  }
  func.func @transform_1(%arg0: i32, %arg1: i32, %arg2: i32) -> (i32, i32) {
    %c0_i32 = arith.constant 0 : i32
    return %arg2, %arg1 : i32, i32
  }
  func.func @transform_2(%arg0: i32, %arg1: i32, %arg2: i32) -> (i32, i32) {
    %c0_i32 = arith.constant 0 : i32
    %c0_i32_0 = arith.constant 0 : i32
    return %c0_i32, %arg1 : i32, i32
  }
  func.func @transform_3(%arg0: i32, %arg1: i32, %arg2: i32) -> (i32, i32) {
    %c0_i32 = arith.constant 0 : i32
    return %arg0, %arg1 : i32, i32
  }
}

module attributes {stable_mosaic.version = 11 : i64} {
  func.func @_mm_kernel(%arg0: i32, %arg1: i32, %arg2: i32, %arg3: memref<16x128xf32, #tpu.memory_space<vmem>>, %arg4: memref<128x256xf32, #tpu.memory_space<vmem>>, %arg5: memref<1x256xf32, #tpu.memory_space<vmem>>, %arg6: memref<16x256xf32, #tpu.memory_space<vmem>>, %arg7: memref<16x256xf32, #tpu.memory_space<vmem>>) attributes {dimension_semantics = [#tpu.dimension_semantics<parallel>, #tpu.dimension_semantics<parallel>, #tpu.dimension_semantics<arbitrary>], iteration_bounds = array<i64: 1, 4, 1>, scalar_prefetch = 0 : i64, scratch_operands = 1 : i64, tpu.core_type = #tpu.core_type<tc>, window_params = [{transform_indices = @transform_0, window_bounds = array<i64: 16, 128>}, {transform_indices = @transform_1, window_bounds = array<i64: 128, 256>}, {transform_indices = @transform_2, window_bounds = array<i64: 1, 256>}, {transform_indices = @transform_3, window_bounds = array<i64: 16, 256>}]} {
    %c0_i32 = arith.constant 0 : i32
    %0 = arith.cmpi eq, %arg2, %c0_i32 : i32
    %1 = arith.extui %0 : i1 to i32
    %c0_i32_0 = arith.constant 0 : i32
    %2 = arith.cmpi ne, %1, %c0_i32_0 : i32
    scf.if %2 {
      %cst_10 = arith.constant 0.000000e+00 : f32
      %12 = vector.broadcast %cst_10 : f32 to vector<16x256xf32>
      %c0_11 = arith.constant 0 : index
      %c0_12 = arith.constant 0 : index
      %13 = vector.load %arg7[%c0_11, %c0_12] : memref<16x256xf32, #tpu.memory_space<vmem>>, vector<16x256xf32>
      tpu.vector_store %arg7[%c0_11, %c0_12], %12 {strides = array<i32>} : memref<16x256xf32, #tpu.memory_space<vmem>>, vector<16x256xf32>,
    } else {
    }
    %c0 = arith.constant 0 : index
    %c0_1 = arith.constant 0 : index
    %3 = vector.load %arg7[%c0, %c0_1] : memref<16x256xf32, #tpu.memory_space<vmem>>, vector<16x256xf32>
    %c0_2 = arith.constant 0 : index
    %c0_3 = arith.constant 0 : index
    %4 = vector.load %arg3[%c0_2, %c0_3] : memref<16x128xf32, #tpu.memory_space<vmem>>, vector<16x128xf32>
    %c0_4 = arith.constant 0 : index
    %c0_5 = arith.constant 0 : index
    %5 = vector.load %arg4[%c0_4, %c0_5] : memref<128x256xf32, #tpu.memory_space<vmem>>, vector<128x256xf32>
    %cst = arith.constant dense<0.000000e+00> : vector<16x256xf32>
    %6 = tpu.matmul %4, %5, %cst {dimension_numbers = #tpu.dot_dimension_numbers<[1], [0], [0], [1], [0, 0, 1, 1], [], []>} : vector<16x128xf32>, vector<128x256xf32>, vector<16x256xf32> -> vector<16x256xf32>
    %7 = arith.addf %3, %6 : vector<16x256xf32>
    %c0_6 = arith.constant 0 : index
    %c0_7 = arith.constant 0 : index
    %8 = vector.load %arg7[%c0_6, %c0_7] : memref<16x256xf32, #tpu.memory_space<vmem>>, vector<16x256xf32>
    tpu.vector_store %arg7[%c0_6, %c0_7], %7 {strides = array<i32>} : memref<16x256xf32, #tpu.memory_space<vmem>>, vector<16x256xf32>,
    %c0_i32_8 = arith.constant 0 : i32
    %9 = arith.cmpi eq, %arg2, %c0_i32_8 : i32
    %10 = arith.extui %9 : i1 to i32
    %c0_i32_9 = arith.constant 0 : i32
    %11 = arith.cmpi ne, %10, %c0_i32_9 : i32
    scf.if %11 {
      %c0_10 = arith.constant 0 : index
      %c0_11 = arith.constant 0 : index
      %12 = vector.load %arg7[%c0_10, %c0_11] : memref<16x256xf32, #tpu.memory_space<vmem>>, vector<16x256xf32>
      %c0_12 = arith.constant 0 : index
      %c0_13 = arith.constant 0 : index
      %13 = vector.load %arg5[%c0_12, %c0_13] : memref<1x256xf32, #tpu.memory_space<vmem>>, vector<1x256xf32>
      %14 = vector.broadcast %13 : vector<1x256xf32> to vector<16x256xf32>
      %15 = arith.addf %12, %14 : vector<16x256xf32>
      %c0_14 = arith.constant 0 : index
      %c0_15 = arith.constant 0 : index
      %16 = vector.load %arg6[%c0_14, %c0_15] : memref<16x256xf32, #tpu.memory_space<vmem>>, vector<16x256xf32>
      tpu.vector_store %arg6[%c0_14, %c0_15], %15 {strides = array<i32>} : memref<16x256xf32, #tpu.memory_space<vmem>>, vector<16x256xf32>,
    } else {
    }
    return
  }
  func.func @transform_0(%arg0: i32, %arg1: i32, %arg2: i32) -> (i32, i32) {
    %c0_i32 = arith.constant 0 : i32
    return %arg0, %arg2 : i32, i32
  }
  func.func @transform_1(%arg0: i32, %arg1: i32, %arg2: i32) -> (i32, i32) {
    %c0_i32 = arith.constant 0 : i32
    return %arg2, %arg1 : i32, i32
  }
  func.func @transform_2(%arg0: i32, %arg1: i32, %arg2: i32) -> (i32, i32) {
    %c0_i32 = arith.constant 0 : i32
    %c0_i32_0 = arith.constant 0 : i32
    return %c0_i32, %arg1 : i32, i32
  }
  func.func @transform_3(%arg0: i32, %arg1: i32, %arg2: i32) -> (i32, i32) {
    %c0_i32 = arith.constant 0 : i32
    return %arg0, %arg1 : i32, i32
  }
}

module attributes {stable_mosaic.version = 11 : i64} {
  func.func @_mm_kernel(%arg0: i32, %arg1: i32, %arg2: i32, %arg3: memref<16x512xbf16, #tpu.memory_space<vmem>>, %arg4: memref<512x256xbf16, #tpu.memory_space<vmem>>, %arg5: memref<1x256xf32, #tpu.memory_space<vmem>>, %arg6: memref<16x256xf32, #tpu.memory_space<vmem>>, %arg7: memref<16x256xf32, #tpu.memory_space<vmem>>) attributes {dimension_semantics = [#tpu.dimension_semantics<parallel>, #tpu.dimension_semantics<parallel>, #tpu.dimension_semantics<arbitrary>], iteration_bounds = array<i64: 1, 1, 2>, scalar_prefetch = 0 : i64, scratch_operands = 1 : i64, tpu.core_type = #tpu.core_type<tc>, window_params = [{transform_indices = @transform_0, window_bounds = array<i64: 16, 512>}, {transform_indices = @transform_1, window_bounds = array<i64: 512, 256>}, {transform_indices = @transform_2, window_bounds = array<i64: 1, 256>}, {transform_indices = @transform_3, window_bounds = array<i64: 16, 256>}]} {
    %c0_i32 = arith.constant 0 : i32
    %0 = arith.cmpi eq, %arg2, %c0_i32 : i32
    %1 = arith.extui %0 : i1 to i32
    %c0_i32_0 = arith.constant 0 : i32
    %2 = arith.cmpi ne, %1, %c0_i32_0 : i32
    scf.if %2 {
      %cst_9 = arith.constant 0.000000e+00 : f32
      %12 = vector.broadcast %cst_9 : f32 to vector<16x256xf32>
      %c0_10 = arith.constant 0 : index
      %c0_11 = arith.constant 0 : index
      %13 = vector.load %arg7[%c0_10, %c0_11] : memref<16x256xf32, #tpu.memory_space<vmem>>, vector<16x256xf32>
      tpu.vector_store %arg7[%c0_10, %c0_11], %12 {strides = array<i32>} : memref<16x256xf32, #tpu.memory_space<vmem>>, vector<16x256xf32>,
    } else {
    }
    %c0 = arith.constant 0 : index
    %c0_1 = arith.constant 0 : index
    %3 = vector.load %arg7[%c0, %c0_1] : memref<16x256xf32, #tpu.memory_space<vmem>>, vector<16x256xf32>
    %c0_2 = arith.constant 0 : index
    %c0_3 = arith.constant 0 : index
    %4 = vector.load %arg3[%c0_2, %c0_3] : memref<16x512xbf16, #tpu.memory_space<vmem>>, vector<16x512xbf16>
    %c0_4 = arith.constant 0 : index
    %c0_5 = arith.constant 0 : index
    %5 = vector.load %arg4[%c0_4, %c0_5] : memref<512x256xbf16, #tpu.memory_space<vmem>>, vector<512x256xbf16>
    %cst = arith.constant dense<0.000000e+00> : vector<16x256xf32>
    %6 = tpu.matmul %4, %5, %cst {dimension_numbers = #tpu.dot_dimension_numbers<[1], [0], [0], [1], [0, 0, 1, 1], [], []>} : vector<16x512xbf16>, vector<512x256xbf16>, vector<16x256xf32> -> vector<16x256xf32>
    %7 = arith.addf %3, %6 : vector<16x256xf32>
    %c0_6 = arith.constant 0 : index
    %c0_7 = arith.constant 0 : index
    %8 = vector.load %arg7[%c0_6, %c0_7] : memref<16x256xf32, #tpu.memory_space<vmem>>, vector<16x256xf32>
    tpu.vector_store %arg7[%c0_6, %c0_7], %7 {strides = array<i32>} : memref<16x256xf32, #tpu.memory_space<vmem>>, vector<16x256xf32>,
    %c1_i32 = arith.constant 1 : i32
    %9 = arith.cmpi eq, %arg2, %c1_i32 : i32
    %10 = arith.extui %9 : i1 to i32
    %c0_i32_8 = arith.constant 0 : i32
    %11 = arith.cmpi ne, %10, %c0_i32_8 : i32
    scf.if %11 {
      %c0_9 = arith.constant 0 : index
      %c0_10 = arith.constant 0 : index
      %12 = vector.load %arg7[%c0_9, %c0_10] : memref<16x256xf32, #tpu.memory_space<vmem>>, vector<16x256xf32>
      %c0_11 = arith.constant 0 : index
      %c0_12 = arith.constant 0 : index
      %13 = vector.load %arg5[%c0_11, %c0_12] : memref<1x256xf32, #tpu.memory_space<vmem>>, vector<1x256xf32>
      %14 = vector.broadcast %13 : vector<1x256xf32> to vector<16x256xf32>
      %15 = arith.addf %12, %14 : vector<16x256xf32>
      %c0_13 = arith.constant 0 : index
      %c0_14 = arith.constant 0 : index
      %16 = vector.load %arg6[%c0_13, %c0_14] : memref<16x256xf32, #tpu.memory_space<vmem>>, vector<16x256xf32>
      tpu.vector_store %arg6[%c0_13, %c0_14], %15 {strides = array<i32>} : memref<16x256xf32, #tpu.memory_space<vmem>>, vector<16x256xf32>,
    } else {
    }
    return
  }
  func.func @transform_0(%arg0: i32, %arg1: i32, %arg2: i32) -> (i32, i32) {
    %c0_i32 = arith.constant 0 : i32
    return %arg0, %arg2 : i32, i32
  }
  func.func @transform_1(%arg0: i32, %arg1: i32, %arg2: i32) -> (i32, i32) {
    %c0_i32 = arith.constant 0 : i32
    return %arg2, %arg1 : i32, i32
  }
  func.func @transform_2(%arg0: i32, %arg1: i32, %arg2: i32) -> (i32, i32) {
    %c0_i32 = arith.constant 0 : i32
    %c0_i32_0 = arith.constant 0 : i32
    return %c0_i32, %arg1 : i32, i32
  }
  func.func @transform_3(%arg0: i32, %arg1: i32, %arg2: i32) -> (i32, i32) {
    %c0_i32 = arith.constant 0 : i32
    return %arg0, %arg1 : i32, i32
  }
}

module attributes {stable_mosaic.version = 11 : i64} {
  func.func @_bigru_kernel(%arg0: memref<8x2x192xf32, #tpu.memory_space<vmem>>, %arg1: memref<64x192xf32, #tpu.memory_space<vmem>>, %arg2: memref<1x192xf32, #tpu.memory_space<vmem>>, %arg3: memref<8x2x64xf32, #tpu.memory_space<vmem>>) attributes {dimension_semantics = [], scalar_prefetch = 0 : i64, scratch_operands = 0 : i64, tpu.core_type = #tpu.core_type<tc>} {
    %cst = arith.constant 0.000000e+00 : f32
    %0 = vector.broadcast %cst : f32 to vector<2x64xf32>
    %c0_i32 = arith.constant 0 : i32
    %c8_i32 = arith.constant 8 : i32
    %1 = arith.addi %c0_i32, %c8_i32 : i32
    %c1_i32 = arith.constant 1 : i32
    %2 = scf.for %arg4 = %c0_i32 to %1 step %c1_i32 iter_args(%arg5 = %0) -> (vector<2x64xf32>)  : i32 {
      %3 = arith.index_cast %arg4 : i32 to index
      %c0 = arith.constant 0 : index
      %c0_1 = arith.constant 0 : index
      %4 = vector.load %arg0[%3, %c0, %c0_1] : memref<8x2x192xf32, #tpu.memory_space<vmem>>, vector<1x2x192xf32>
      %5 = vector.shape_cast %4 : vector<1x2x192xf32> to vector<2x192xf32>
      %c0_2 = arith.constant 0 : index
      %c0_3 = arith.constant 0 : index
      %6 = vector.load %arg1[%c0_2, %c0_3] : memref<64x192xf32, #tpu.memory_space<vmem>>, vector<64x192xf32>
      %cst_4 = arith.constant dense<0.000000e+00> : vector<2x192xf32>
      %7 = tpu.matmul %arg5, %6, %cst_4 {dimension_numbers = #tpu.dot_dimension_numbers<[1], [0], [0], [1], [0, 0, 1, 1], [], []>} : vector<2x64xf32>, vector<64x192xf32>, vector<2x192xf32> -> vector<2x192xf32>
      %c0_5 = arith.constant 0 : index
      %c0_6 = arith.constant 0 : index
      %8 = vector.load %arg2[%c0_5, %c0_6] : memref<1x192xf32, #tpu.memory_space<vmem>>, vector<1x192xf32>
      %9 = vector.broadcast %8 : vector<1x192xf32> to vector<2x192xf32>
      %10 = arith.addf %7, %9 : vector<2x192xf32>
      %11 = vector.extract_strided_slice %5 {offsets = [0, 0], sizes = [2, 64], strides = [1, 1]} : vector<2x192xf32> to vector<2x64xf32>
      %12 = vector.extract_strided_slice %10 {offsets = [0, 0], sizes = [2, 64], strides = [1, 1]} : vector<2x192xf32> to vector<2x64xf32>
      %13 = arith.addf %11, %12 : vector<2x64xf32>
      %14 = arith.negf %13 : vector<2x64xf32>
      %15 = math.exp %14 : vector<2x64xf32>
      %cst_7 = arith.constant 1.000000e+00 : f32
      %16 = vector.broadcast %cst_7 : f32 to vector<2x64xf32>
      %17 = arith.addf %16, %15 : vector<2x64xf32>
      %18 = arith.divf %16, %17 : vector<2x64xf32>
      %19 = vector.extract_strided_slice %5 {offsets = [0, 64], sizes = [2, 64], strides = [1, 1]} : vector<2x192xf32> to vector<2x64xf32>
      %20 = vector.extract_strided_slice %10 {offsets = [0, 64], sizes = [2, 64], strides = [1, 1]} : vector<2x192xf32> to vector<2x64xf32>
      %21 = arith.addf %19, %20 : vector<2x64xf32>
      %22 = arith.negf %21 : vector<2x64xf32>
      %23 = math.exp %22 : vector<2x64xf32>
      %cst_8 = arith.constant 1.000000e+00 : f32
      %24 = vector.broadcast %cst_8 : f32 to vector<2x64xf32>
      %25 = arith.addf %24, %23 : vector<2x64xf32>
      %26 = arith.divf %24, %25 : vector<2x64xf32>
      %27 = vector.extract_strided_slice %5 {offsets = [0, 128], sizes = [2, 64], strides = [1, 1]} : vector<2x192xf32> to vector<2x64xf32>
      %28 = vector.extract_strided_slice %10 {offsets = [0, 128], sizes = [2, 64], strides = [1, 1]} : vector<2x192xf32> to vector<2x64xf32>
      %29 = arith.mulf %18, %28 : vector<2x64xf32>
      %30 = arith.addf %27, %29 : vector<2x64xf32>
      %31 = math.tanh %30 : vector<2x64xf32>
      %cst_9 = arith.constant 1.000000e+00 : f32
      %32 = vector.broadcast %cst_9 : f32 to vector<2x64xf32>
      %33 = arith.subf %32, %26 : vector<2x64xf32>
      %34 = arith.mulf %33, %31 : vector<2x64xf32>
      %35 = arith.mulf %26, %arg5 : vector<2x64xf32>
      %36 = arith.addf %34, %35 : vector<2x64xf32>
      %37 = arith.index_cast %arg4 : i32 to index
      %c0_10 = arith.constant 0 : index
      %c0_11 = arith.constant 0 : index
      %38 = vector.load %arg3[%37, %c0_10, %c0_11] : memref<8x2x64xf32, #tpu.memory_space<vmem>>, vector<1x2x64xf32>
      %39 = vector.shape_cast %38 : vector<1x2x64xf32> to vector<2x64xf32>
      %40 = vector.shape_cast %36 : vector<2x64xf32> to vector<1x2x64xf32>
      tpu.vector_store %arg3[%37, %c0_10, %c0_11], %40 {strides = array<i32>} : memref<8x2x64xf32, #tpu.memory_space<vmem>>, vector<1x2x64xf32>,
      scf.yield %36 : vector<2x64xf32>
    }
    %c8_i32_0 = arith.constant 8 : i32
    return
  }
}

module attributes {stable_mosaic.version = 11 : i64} {
  func.func @_mm_kernel(%arg0: i32, %arg1: i32, %arg2: i32, %arg3: memref<16x128xf32, #tpu.memory_space<vmem>>, %arg4: memref<128x128xf32, #tpu.memory_space<vmem>>, %arg5: memref<1x128xf32, #tpu.memory_space<vmem>>, %arg6: memref<16x128xf32, #tpu.memory_space<vmem>>, %arg7: memref<16x128xf32, #tpu.memory_space<vmem>>) attributes {dimension_semantics = [#tpu.dimension_semantics<parallel>, #tpu.dimension_semantics<parallel>, #tpu.dimension_semantics<arbitrary>], iteration_bounds = array<i64: 1, 1, 1>, scalar_prefetch = 0 : i64, scratch_operands = 1 : i64, tpu.core_type = #tpu.core_type<tc>, window_params = [{transform_indices = @transform_0, window_bounds = array<i64: 16, 128>}, {transform_indices = @transform_1, window_bounds = array<i64: 128, 128>}, {transform_indices = @transform_2, window_bounds = array<i64: 1, 128>}, {transform_indices = @transform_3, window_bounds = array<i64: 16, 128>}]} {
    %c0_i32 = arith.constant 0 : i32
    %0 = arith.cmpi eq, %arg2, %c0_i32 : i32
    %1 = arith.extui %0 : i1 to i32
    %c0_i32_0 = arith.constant 0 : i32
    %2 = arith.cmpi ne, %1, %c0_i32_0 : i32
    scf.if %2 {
      %cst_10 = arith.constant 0.000000e+00 : f32
      %12 = vector.broadcast %cst_10 : f32 to vector<16x128xf32>
      %c0_11 = arith.constant 0 : index
      %c0_12 = arith.constant 0 : index
      %13 = vector.load %arg7[%c0_11, %c0_12] : memref<16x128xf32, #tpu.memory_space<vmem>>, vector<16x128xf32>
      tpu.vector_store %arg7[%c0_11, %c0_12], %12 {strides = array<i32>} : memref<16x128xf32, #tpu.memory_space<vmem>>, vector<16x128xf32>,
    } else {
    }
    %c0 = arith.constant 0 : index
    %c0_1 = arith.constant 0 : index
    %3 = vector.load %arg7[%c0, %c0_1] : memref<16x128xf32, #tpu.memory_space<vmem>>, vector<16x128xf32>
    %c0_2 = arith.constant 0 : index
    %c0_3 = arith.constant 0 : index
    %4 = vector.load %arg3[%c0_2, %c0_3] : memref<16x128xf32, #tpu.memory_space<vmem>>, vector<16x128xf32>
    %c0_4 = arith.constant 0 : index
    %c0_5 = arith.constant 0 : index
    %5 = vector.load %arg4[%c0_4, %c0_5] : memref<128x128xf32, #tpu.memory_space<vmem>>, vector<128x128xf32>
    %cst = arith.constant dense<0.000000e+00> : vector<16x128xf32>
    %6 = tpu.matmul %4, %5, %cst {dimension_numbers = #tpu.dot_dimension_numbers<[1], [0], [0], [1], [0, 0, 1, 1], [], []>} : vector<16x128xf32>, vector<128x128xf32>, vector<16x128xf32> -> vector<16x128xf32>
    %7 = arith.addf %3, %6 : vector<16x128xf32>
    %c0_6 = arith.constant 0 : index
    %c0_7 = arith.constant 0 : index
    %8 = vector.load %arg7[%c0_6, %c0_7] : memref<16x128xf32, #tpu.memory_space<vmem>>, vector<16x128xf32>
    tpu.vector_store %arg7[%c0_6, %c0_7], %7 {strides = array<i32>} : memref<16x128xf32, #tpu.memory_space<vmem>>, vector<16x128xf32>,
    %c0_i32_8 = arith.constant 0 : i32
    %9 = arith.cmpi eq, %arg2, %c0_i32_8 : i32
    %10 = arith.extui %9 : i1 to i32
    %c0_i32_9 = arith.constant 0 : i32
    %11 = arith.cmpi ne, %10, %c0_i32_9 : i32
    scf.if %11 {
      %c0_10 = arith.constant 0 : index
      %c0_11 = arith.constant 0 : index
      %12 = vector.load %arg7[%c0_10, %c0_11] : memref<16x128xf32, #tpu.memory_space<vmem>>, vector<16x128xf32>
      %c0_12 = arith.constant 0 : index
      %c0_13 = arith.constant 0 : index
      %13 = vector.load %arg5[%c0_12, %c0_13] : memref<1x128xf32, #tpu.memory_space<vmem>>, vector<1x128xf32>
      %14 = vector.broadcast %13 : vector<1x128xf32> to vector<16x128xf32>
      %15 = arith.addf %12, %14 : vector<16x128xf32>
      %cst_14 = arith.constant 5.000000e-01 : f32
      %16 = vector.broadcast %cst_14 : f32 to vector<16x128xf32>
      %17 = arith.mulf %16, %15 : vector<16x128xf32>
      %cst_15 = arith.constant 4.471500e-02 : f32
      %18 = vector.broadcast %cst_15 : f32 to vector<16x128xf32>
      %19 = arith.mulf %18, %15 : vector<16x128xf32>
      %20 = arith.mulf %19, %15 : vector<16x128xf32>
      %21 = arith.mulf %20, %15 : vector<16x128xf32>
      %22 = arith.addf %15, %21 : vector<16x128xf32>
      %cst_16 = arith.constant 0.797884583 : f32
      %23 = vector.broadcast %cst_16 : f32 to vector<16x128xf32>
      %24 = arith.mulf %23, %22 : vector<16x128xf32>
      %25 = math.tanh %24 : vector<16x128xf32>
      %cst_17 = arith.constant 1.000000e+00 : f32
      %26 = vector.broadcast %cst_17 : f32 to vector<16x128xf32>
      %27 = arith.addf %26, %25 : vector<16x128xf32>
      %28 = arith.mulf %17, %27 : vector<16x128xf32>
      %c0_18 = arith.constant 0 : index
      %c0_19 = arith.constant 0 : index
      %29 = vector.load %arg6[%c0_18, %c0_19] : memref<16x128xf32, #tpu.memory_space<vmem>>, vector<16x128xf32>
      tpu.vector_store %arg6[%c0_18, %c0_19], %28 {strides = array<i32>} : memref<16x128xf32, #tpu.memory_space<vmem>>, vector<16x128xf32>,
    } else {
    }
    return
  }
  func.func @transform_0(%arg0: i32, %arg1: i32, %arg2: i32) -> (i32, i32) {
    %c0_i32 = arith.constant 0 : i32
    return %arg0, %arg2 : i32, i32
  }
  func.func @transform_1(%arg0: i32, %arg1: i32, %arg2: i32) -> (i32, i32) {
    %c0_i32 = arith.constant 0 : i32
    return %arg2, %arg1 : i32, i32
  }
  func.func @transform_2(%arg0: i32, %arg1: i32, %arg2: i32) -> (i32, i32) {
    %c0_i32 = arith.constant 0 : i32
    %c0_i32_0 = arith.constant 0 : i32
    return %c0_i32, %arg1 : i32, i32
  }
  func.func @transform_3(%arg0: i32, %arg1: i32, %arg2: i32) -> (i32, i32) {
    %c0_i32 = arith.constant 0 : i32
    return %arg0, %arg1 : i32, i32
  }
}

</mosaic_0001>

<bundles_post_ra>
// kernel: resnet_model_forward.5
= control target key start
LH: loop header
LB: loop body
LE: loop exit
PB: predicated region body
PF: predicated region fallthrough
CT: control target
= control target key end

     0   :  { %s1155_s12 = smov 0   ;;  %s1157_s13 = smov 0   ;;  %s1351_s0 = inlined_call_operand.vmem [shape: f32[1024,128], index: 0, kind: input, shape index: {}]   ;;  %s1352_s1 = inlined_call_operand.vmem [shape: f32[128,128], index: 1, kind: input, shape index: {}]   ;;  %s1353_s2 = inlined_call_operand.vmem [shape: f32[1,128], index: 2, kind: input, shape index: {}]   ;;  %s1354_s3 = inlined_call_operand.vmem [shape: f32[1024,128], index: 3, kind: output, shape index: {}]  }
   0x1   :  { %s1159_s14 = smov 0  }
   0x2 LB: > { %s32_s15 = sadd.s32 1, %s1129_s13  ;;  %p919_p0 = scmp.ge.s32.totalorder %s1133_s14, 1  ;;  %s1133_s14 = sphi %s1159_s14, %s13_s14   ;;  %s1129_s13 = sphi %s1157_s13, %s1356_s13   ;;  %s1125_s12 = sphi %s1155_s12, %s1355_s12  }
   0x3   : > { %p34_p1 = scmp.ge.s32.totalorder %s32_s15, 4  ;;  %p188_p2 = scmp.lt.s32.totalorder %s1133_s14, 5 }
   0x5   : > { %s1358_s15 = smov (%p34_p1, %s32_s15), 0  ;;  %p189_p3 = pnand %p919_p0, %p188_p2 }
   0x6   : > { %s920_s5 = sshll.u32 (!%p189_p3), %s1125_s12, 5 }
   0x7   : > { %192 = sbr.rel (%p189_p3) target bundleno = 274 (0x112), region = 32  ;;  %p230_p4 = scmp.lt.s32.totalorder (!%p189_p3), %s920_s5, 127 }
   0xc   : > { %v374_v0 = vld [vmem:[%s1352_s1 + $0x78] sm:$0xff]  ;;  %v373_v1 = vld [vmem:[%s1352_s1 + $0x70] sm:$0xff]  ;;  %v372_v2 = vld [vmem:[%s1352_s1 + $0x68] sm:$0xff]  ;;  %s1360_s5 = smov (!%p230_p4, %s920_s5), 127 }
   0xd   : > { %975 = vmatprep.subr.mxu0 %v374_v0  ;;  %1055 = vmatprep.subr.mxu1 %v374_v0  ;;  %v371_v3 = vld [vmem:[%s1352_s1 + $0x60] sm:$0xff]  ;;  %v370_v4 = vld [vmem:[%s1352_s1 + $0x58] sm:$0xff]  ;;  %v369_v5 = vld [vmem:[%s1352_s1 + $0x50] sm:$0xff]  ;;  %s921_s21 = sshll.u32 %s1360_s5, 3 }
   0xe   : > { %976 = vmatpush3.msra.mxu0 %v374_v0  ;;  %1071 = vmatpush3.msra.mxu1 %v374_v0  ;;  %v368_v6 = vld [vmem:[%s1352_s1 + $0x48] sm:$0xff]  ;;  %v367_v7 = vld [vmem:[%s1352_s1 + $0x40] sm:$0xff]  ;;  %v366_v8 = vld [vmem:[%s1352_s1 + $0x38] sm:$0xff]  ;;  %s1229_s26 = scalar_lea.vmem %s1351_s0, %s921_s21  ;;  %s1278_s7 = scalar_lea.vmem %s1354_s3, %s921_s21 }
   0xf   : > { %977 = vmatprep.subr.mxu0 %v373_v1  ;;  %1056 = vmatprep.subr.mxu1 %v373_v1  ;;  %v365_v9 = vld [vmem:[%s1352_s1 + $0x30] sm:$0xff]  ;;  %v364_v10 = vld [vmem:[%s1352_s1 + $0x28] sm:$0xff]  ;;  %v363_v11 = vld [vmem:[%s1352_s1 + $0x20] sm:$0xff] }
  0x10   : > { %978 = vmatpush3.msra.mxu0 %v373_v1  ;;  %1072 = vmatpush3.msra.mxu1 %v373_v1  ;;  %v362_v12 = vld [vmem:[%s1352_s1 + $0x18] sm:$0xff]  ;;  %v361_v13 = vld [vmem:[%s1352_s1 + $0x10] sm:$0xff]  ;;  %v360_v14 = vld [vmem:[%s1352_s1 + $0x8] sm:$0xff] }
  0x11   : > { %979 = vmatprep.subr.mxu0 %v372_v2  ;;  %1057 = vmatprep.subr.mxu1 %v372_v2  ;;  %v359_v15 = vld [vmem:[%s1352_s1] sm:$0xff]  ;;  %v328_v18 = vld [vmem:[%s1229_s26 + $0x8] sm:$0xff]  ;;  %v329_v20 = vld [vmem:[%s1229_s26 + $0x10] sm:$0xff] }
  0x12   : > { %980 = vmatpush3.msra.mxu0 %v372_v2  ;;  %1073 = vmatpush3.msra.mxu1 %v372_v2  ;;  %v327_v16 = vld [vmem:[%s1229_s26] sm:$0xff]  ;;  %v344_v19 = vld [vmem:[%s1229_s26 + $0x88] sm:$0xff]  ;;  %v345_v21 = vld [vmem:[%s1229_s26 + $0x90] sm:$0xff] }
  0x13   : > { %981 = vmatprep.subr.mxu0 %v371_v3  ;;  %1058 = vmatprep.subr.mxu1 %v371_v3  ;;  %v343_v17 = vld [vmem:[%s1229_s26 + $0x80] sm:$0xff]  ;;  %v330_v22 = vld [vmem:[%s1229_s26 + $0x18] sm:$0xff]  ;;  %v332_v26 = vld [vmem:[%s1229_s26 + $0x28] sm:$0xff] }
  0x14   : > { %982 = vmatpush3.msra.mxu0 %v371_v3  ;;  %1074 = vmatpush3.msra.mxu1 %v371_v3  ;;  %v346_v23 = vld [vmem:[%s1229_s26 + $0x98] sm:$0xff]  ;;  %v331_v24 = vld [vmem:[%s1229_s26 + $0x20] sm:$0xff]  ;;  %v348_v27 = vld [vmem:[%s1229_s26 + $0xa8] sm:$0xff] }
  0x15   : > { %983 = vmatprep.subr.mxu0 %v370_v4  ;;  %1059 = vmatprep.subr.mxu1 %v370_v4  ;;  %v347_v25 = vld [vmem:[%s1229_s26 + $0xa0] sm:$0xff]  ;;  %v333_v28 = vld [vmem:[%s1229_s26 + $0x30] sm:$0xff]  ;;  %v334_v30 = vld [vmem:[%s1229_s26 + $0x38] sm:$0xff] }
  0x16   : > { %984 = vmatpush3.msra.mxu0 %v370_v4  ;;  %1075 = vmatpush3.msra.mxu1 %v370_v4  ;;  %v349_v29 = vld [vmem:[%s1229_s26 + $0xb0] sm:$0xff]  ;;  %v350_v31 = vld [vmem:[%s1229_s26 + $0xb8] sm:$0xff]  ;;  %v335_v32 = vld [vmem:[%s1229_s26 + $0x40] sm:$0xff] }
  0x17   : > { %985 = vmatprep.subr.mxu0 %v369_v5  ;;  %1060 = vmatprep.subr.mxu1 %v369_v5  ;;  %v351_v33 = vld [vmem:[%s1229_s26 + $0xc0] sm:$0xff]  ;;  %v336_v34 = vld [vmem:[%s1229_s26 + $0x48] sm:$0xff]  ;;  %v337_v36 = vld [vmem:[%s1229_s26 + $0x50] sm:$0xff] }
  0x18   : > { %986 = vmatpush3.msra.mxu0 %v369_v5  ;;  %1076 = vmatpush3.msra.mxu1 %v369_v5  ;;  %v352_v35 = vld [vmem:[%s1229_s26 + $0xc8] sm:$0xff]  ;;  %v353_v37 = vld [vmem:[%s1229_s26 + $0xd0] sm:$0xff]  ;;  %v338_v38 = vld [vmem:[%s1229_s26 + $0x58] sm:$0xff] }
  0x19   : > { %987 = vmatprep.subr.mxu0 %v368_v6  ;;  %1061 = vmatprep.subr.mxu1 %v368_v6  ;;  %v354_v39 = vld [vmem:[%s1229_s26 + $0xd8] sm:$0xff]  ;;  %v339_v40 = vld [vmem:[%s1229_s26 + $0x60] sm:$0xff]  ;;  %v340_v42 = vld [vmem:[%s1229_s26 + $0x68] sm:$0xff] }
  0x1a   : > { %988 = vmatpush3.msra.mxu0 %v368_v6  ;;  %1077 = vmatpush3.msra.mxu1 %v368_v6  ;;  %v355_v41 = vld [vmem:[%s1229_s26 + $0xe0] sm:$0xff]  ;;  %v356_v43 = vld [vmem:[%s1229_s26 + $0xe8] sm:$0xff]  ;;  %v341_v44 = vld [vmem:[%s1229_s26 + $0x70] sm:$0xff] }
  0x1b   : > { %989 = vmatprep.subr.mxu0 %v367_v7  ;;  %1062 = vmatprep.subr.mxu1 %v367_v7  ;;  %v357_v45 = vld [vmem:[%s1229_s26 + $0xf0] sm:$0xff]  ;;  %v342_v46 = vld [vmem:[%s1229_s26 + $0x78] sm:$0xff]  ;;  %v1269_v48 = vld [vmem:[%s1353_s2] ss:$0 sm:$0xff] }
  0x1c   : > { %990 = vmatpush3.msra.mxu0 %v367_v7  ;;  %1078 = vmatpush3.msra.mxu1 %v367_v7  ;;  %v358_v47 = vld [vmem:[%s1229_s26 + $0xf8] sm:$0xff] }
  0x1d   : > { %991 = vmatprep.subr.mxu0 %v366_v8  ;;  %1063 = vmatprep.subr.mxu1 %v366_v8 }
  0x1e   : > { %992 = vmatpush3.msra.mxu0 %v366_v8  ;;  %1079 = vmatpush3.msra.mxu1 %v366_v8 }
  0x1f   : > { %993 = vmatprep.subr.mxu0 %v365_v9  ;;  %1064 = vmatprep.subr.mxu1 %v365_v9 }
  0x20   : > { %994 = vmatpush3.msra.mxu0 %v365_v9  ;;  %1080 = vmatpush3.msra.mxu1 %v365_v9 }
  0x21   : > { %995 = vmatprep.subr.mxu0 %v364_v10  ;;  %1065 = vmatprep.subr.mxu1 %v364_v10 }
  0x22   : > { %996 = vmatpush3.msra.mxu0 %v364_v10  ;;  %1081 = vmatpush3.msra.mxu1 %v364_v10 }
  0x23   : > { %997 = vmatprep.subr.mxu0 %v363_v11  ;;  %1066 = vmatprep.subr.mxu1 %v363_v11 }
  0x24   : > { %998 = vmatpush3.msra.mxu0 %v363_v11  ;;  %1082 = vmatpush3.msra.mxu1 %v363_v11 }
  0x25   : > { %999 = vmatprep.subr.mxu0 %v362_v12  ;;  %1067 = vmatprep.subr.mxu1 %v362_v12 }
  0x26   : > { %1000 = vmatpush3.msra.mxu0 %v362_v12  ;;  %1083 = vmatpush3.msra.mxu1 %v362_v12 }
  0x27   : > { %1001 = vmatprep.subr.mxu0 %v361_v13  ;;  %1068 = vmatprep.subr.mxu1 %v361_v13 }
  0x28   : > { %1002 = vmatpush3.msra.mxu0 %v361_v13  ;;  %1084 = vmatpush3.msra.mxu1 %v361_v13 }
  0x29   : > { %1003 = vmatprep.subr.mxu0 %v360_v14  ;;  %1069 = vmatprep.subr.mxu1 %v360_v14 }
  0x2a   : > { %1004 = vmatpush3.msra.mxu0 %v360_v14  ;;  %1085 = vmatpush3.msra.mxu1 %v360_v14 }
  0x2b   : > { %1005 = vmatprep.subr.mxu0 %v359_v15  ;;  %1070 = vmatprep.subr.mxu1 %v359_v15 }
  0x2c   : > { %1006 = vmatpush3.msra.mxu0 %v359_v15  ;;  %1086 = vmatpush3.msra.mxu1 %v359_v15 }
  0x2d   : > { %1007 = vmatprep.mubr.f32.mxu0 %v327_v16  ;;  %1031 = vmatprep.mubr.f32.mxu1 %v343_v17 }
  0x2e   : > { %1008 = vmatmul.mubr.f32.vlgmr.msra.gmra.mxu0 %v328_v18  ;;  %1032 = vmatmul.mubr.f32.vlgmr.msra.gmra.mxu1 %v344_v19 }
  0x2f   : > { %1010 = vmatprep.mubr.f32.mxu0 %v329_v20  ;;  %1034 = vmatprep.mubr.f32.mxu1 %v345_v21 }
  0x32   : > { %1011 = vmatmul.mubr.f32.gmra.mxu0 %v330_v22  ;;  %1035 = vmatmul.mubr.f32.gmra.mxu1 %v346_v23 }
  0x33   : > { %1013 = vmatprep.mubr.f32.mxu0 %v331_v24  ;;  %1037 = vmatprep.mubr.f32.mxu1 %v347_v25 }
  0x36   : > { %1014 = vmatmul.mubr.f32.gmra.mxu0 %v332_v26  ;;  %1038 = vmatmul.mubr.f32.gmra.mxu1 %v348_v27 }
  0x37   : > { %1016 = vmatprep.mubr.f32.mxu0 %v333_v28  ;;  %1040 = vmatprep.mubr.f32.mxu1 %v349_v29 }
  0x3a   : > { %1017 = vmatmul.mubr.f32.gmra.mxu0 %v334_v30  ;;  %1041 = vmatmul.mubr.f32.gmra.mxu1 %v350_v31 }
  0x3b   : > { %1019 = vmatprep.mubr.f32.mxu0 %v335_v32  ;;  %1043 = vmatprep.mubr.f32.mxu1 %v351_v33 }
  0x3e   : > { %1020 = vmatmul.mubr.f32.gmra.mxu0 %v336_v34  ;;  %1044 = vmatmul.mubr.f32.gmra.mxu1 %v352_v35 }
  0x3f   : > { %1022 = vmatprep.mubr.f32.mxu0 %v337_v36  ;;  %1046 = vmatprep.mubr.f32.mxu1 %v353_v37 }
  0x42   : > { %1023 = vmatmul.mubr.f32.gmra.mxu0 %v338_v38  ;;  %1047 = vmatmul.mubr.f32.gmra.mxu1 %v354_v39 }
  0x43   : > { %1025 = vmatprep.mubr.f32.mxu0 %v339_v40  ;;  %1049 = vmatprep.mubr.f32.mxu1 %v355_v41 }
  0x46   : > { %1026 = vmatmul.mubr.f32.gmra.mxu0 %v340_v42  ;;  %1050 = vmatmul.mubr.f32.gmra.mxu1 %v356_v43 }
  0x47   : > { %1028 = vmatprep.mubr.f32.mxu0 %v341_v44  ;;  %1052 = vmatprep.mubr.f32.mxu1 %v357_v45 }
  0x4a   : > { %1029 = vmatmul.mubr.f32.gmra.mxu0 %v342_v46  ;;  %1053 = vmatmul.mubr.f32.gmra.mxu1 %v358_v47 }
  0xee   : > { %v1009_v49 = vpop.f32.mrf.mxu0  ;;  %v1033_v50 = vpop.f32.mrf.mxu1 }
  0xef   : > { %v707_v51 = vadd.f32 %v1009_v49, %v1269_v48  ;;  %v723_v52 = vadd.f32 %v1033_v50, %v1269_v48 }
  0xf0   : > { %v441_v53 = vpop.f32.mrf.mxu0  ;;  %v521_v54 = vpop.f32.mrf.mxu1 }
  0xf1   : > { %v739_v55 = vmax.f32 %v707_v51, 0.0  ;;  %v755_v56 = vmax.f32 %v723_v52, 0.0  ;;  %v706_v57 = vadd.f32 %v1269_v48, %v441_v53  ;;  %v722_v58 = vadd.f32 %v1269_v48, %v521_v54 }
  0xf2   : > { %v1012_v59 = vpop.f32.mrf.mxu0  ;;  %v1036_v60 = vpop.f32.mrf.mxu1 }
  0xf3   : > { %771 = vst [vmem:[%s1278_s7 + $0x8] sm:$0xff] %v739_v55  ;;  %787 = vst [vmem:[%s1278_s7 + $0x88] sm:$0xff] %v755_v56  ;;  %v738_v61 = vmax.f32 %v706_v57, 0.0  ;;  %v754_v62 = vmax.f32 %v722_v58, 0.0  ;;  %v709_v63 = vadd.f32 %v1012_v59, %v1269_v48  ;;  %v725_v0 = vadd.f32 %v1036_v60, %v1269_v48 }
  0xf4   : > { %v451_v1 = vpop.f32.mrf.mxu0  ;;  %v531_v2 = vpop.f32.mrf.mxu1 }
  0xf5   : > { %770 = vst [vmem:[%s1278_s7] sm:$0xff] %v738_v61  ;;  %786 = vst [vmem:[%s1278_s7 + $0x80] sm:$0xff] %v754_v62  ;;  %v741_v3 = vmax.f32 %v709_v63, 0.0  ;;  %v757_v4 = vmax.f32 %v725_v0, 0.0  ;;  %v708_v5 = vadd.f32 %v1269_v48, %v451_v1  ;;  %v724_v6 = vadd.f32 %v1269_v48, %v531_v2 }
  0xf6   : > { %v1015_v7 = vpop.f32.mrf.mxu0  ;;  %v1039_v8 = vpop.f32.mrf.mxu1 }
  0xf7   : > { %773 = vst [vmem:[%s1278_s7 + $0x18] sm:$0xff] %v741_v3  ;;  %789 = vst [vmem:[%s1278_s7 + $0x98] sm:$0xff] %v757_v4  ;;  %v740_v9 = vmax.f32 %v708_v5, 0.0  ;;  %v756_v10 = vmax.f32 %v724_v6, 0.0  ;;  %v711_v11 = vadd.f32 %v1015_v7, %v1269_v48  ;;  %v727_v12 = vadd.f32 %v1039_v8, %v1269_v48 }
  0xf8   : > { %v461_v13 = vpop.f32.mrf.mxu0  ;;  %v541_v14 = vpop.f32.mrf.mxu1 }
  0xf9   : > { %772 = vst [vmem:[%s1278_s7 + $0x10] sm:$0xff] %v740_v9  ;;  %788 = vst [vmem:[%s1278_s7 + $0x90] sm:$0xff] %v756_v10  ;;  %v743_v15 = vmax.f32 %v711_v11, 0.0  ;;  %v759_v16 = vmax.f32 %v727_v12, 0.0  ;;  %v710_v17 = vadd.f32 %v1269_v48, %v461_v13  ;;  %v726_v18 = vadd.f32 %v1269_v48, %v541_v14 }
  0xfa   : > { %v1018_v19 = vpop.f32.mrf.mxu0  ;;  %v1042_v20 = vpop.f32.mrf.mxu1 }
  0xfb   : > { %775 = vst [vmem:[%s1278_s7 + $0x28] sm:$0xff] %v743_v15  ;;  %791 = vst [vmem:[%s1278_s7 + $0xa8] sm:$0xff] %v759_v16  ;;  %v742_v21 = vmax.f32 %v710_v17, 0.0  ;;  %v758_v22 = vmax.f32 %v726_v18, 0.0  ;;  %v713_v23 = vadd.f32 %v1018_v19, %v1269_v48  ;;  %v729_v24 = vadd.f32 %v1042_v20, %v1269_v48 }
  0xfc   : > { %v471_v25 = vpop.f32.mrf.mxu0  ;;  %v551_v26 = vpop.f32.mrf.mxu1 }
  0xfd   : > { %774 = vst [vmem:[%s1278_s7 + $0x20] sm:$0xff] %v742_v21  ;;  %790 = vst [vmem:[%s1278_s7 + $0xa0] sm:$0xff] %v758_v22  ;;  %v745_v27 = vmax.f32 %v713_v23, 0.0  ;;  %v761_v28 = vmax.f32 %v729_v24, 0.0  ;;  %v712_v29 = vadd.f32 %v1269_v48, %v471_v25  ;;  %v728_v30 = vadd.f32 %v1269_v48, %v551_v26 }
  0xfe   : > { %v1021_v31 = vpop.f32.mrf.mxu0  ;;  %v1045_v32 = vpop.f32.mrf.mxu1 }
  0xff   : > { %777 = vst [vmem:[%s1278_s7 + $0x38] sm:$0xff] %v745_v27  ;;  %793 = vst [vmem:[%s1278_s7 + $0xb8] sm:$0xff] %v761_v28  ;;  %v744_v33 = vmax.f32 %v712_v29, 0.0  ;;  %v760_v34 = vmax.f32 %v728_v30, 0.0  ;;  %v715_v35 = vadd.f32 %v1021_v31, %v1269_v48  ;;  %v731_v36 = vadd.f32 %v1045_v32, %v1269_v48 }
 0x100   : > { %v481_v37 = vpop.f32.mrf.mxu0  ;;  %v561_v38 = vpop.f32.mrf.mxu1 }
 0x101   : > { %776 = vst [vmem:[%s1278_s7 + $0x30] sm:$0xff] %v744_v33  ;;  %792 = vst [vmem:[%s1278_s7 + $0xb0] sm:$0xff] %v760_v34  ;;  %v747_v39 = vmax.f32 %v715_v35, 0.0  ;;  %v763_v40 = vmax.f32 %v731_v36, 0.0  ;;  %v714_v41 = vadd.f32 %v1269_v48, %v481_v37  ;;  %v730_v42 = vadd.f32 %v1269_v48, %v561_v38 }
 0x102   : > { %v1024_v43 = vpop.f32.mrf.mxu0  ;;  %v1048_v44 = vpop.f32.mrf.mxu1 }
 0x103   : > { %779 = vst [vmem:[%s1278_s7 + $0x48] sm:$0xff] %v747_v39  ;;  %795 = vst [vmem:[%s1278_s7 + $0xc8] sm:$0xff] %v763_v40  ;;  %v746_v45 = vmax.f32 %v714_v41, 0.0  ;;  %v762_v46 = vmax.f32 %v730_v42, 0.0  ;;  %v717_v47 = vadd.f32 %v1024_v43, %v1269_v48  ;;  %v733_v49 = vadd.f32 %v1048_v44, %v1269_v48 }
 0x104   : > { %v491_v50 = vpop.f32.mrf.mxu0  ;;  %v571_v51 = vpop.f32.mrf.mxu1 }
 0x105   : > { %778 = vst [vmem:[%s1278_s7 + $0x40] sm:$0xff] %v746_v45  ;;  %794 = vst [vmem:[%s1278_s7 + $0xc0] sm:$0xff] %v762_v46  ;;  %v749_v52 = vmax.f32 %v717_v47, 0.0  ;;  %v765_v53 = vmax.f32 %v733_v49, 0.0  ;;  %v716_v54 = vadd.f32 %v1269_v48, %v491_v50  ;;  %v732_v55 = vadd.f32 %v1269_v48, %v571_v51 }
 0x106   : > { %v1027_v56 = vpop.f32.mrf.mxu0  ;;  %v1051_v57 = vpop.f32.mrf.mxu1 }
 0x107   : > { %781 = vst [vmem:[%s1278_s7 + $0x58] sm:$0xff] %v749_v52  ;;  %797 = vst [vmem:[%s1278_s7 + $0xd8] sm:$0xff] %v765_v53  ;;  %v748_v58 = vmax.f32 %v716_v54, 0.0  ;;  %v764_v59 = vmax.f32 %v732_v55, 0.0  ;;  %v719_v60 = vadd.f32 %v1027_v56, %v1269_v48  ;;  %v735_v61 = vadd.f32 %v1051_v57, %v1269_v48 }
 0x108   : > { %v501_v62 = vpop.f32.mrf.mxu0  ;;  %v581_v63 = vpop.f32.mrf.mxu1 }
 0x109   : > { %780 = vst [vmem:[%s1278_s7 + $0x50] sm:$0xff] %v748_v58  ;;  %796 = vst [vmem:[%s1278_s7 + $0xd0] sm:$0xff] %v764_v59  ;;  %v751_v0 = vmax.f32 %v719_v60, 0.0  ;;  %v767_v1 = vmax.f32 %v735_v61, 0.0  ;;  %v718_v2 = vadd.f32 %v1269_v48, %v501_v62  ;;  %v734_v3 = vadd.f32 %v1269_v48, %v581_v63 }
 0x10a   : > { %v1030_v4 = vpop.f32.mrf.mxu0  ;;  %v1054_v5 = vpop.f32.mrf.mxu1 }
 0x10b   : > { %783 = vst [vmem:[%s1278_s7 + $0x68] sm:$0xff] %v751_v0  ;;  %799 = vst [vmem:[%s1278_s7 + $0xe8] sm:$0xff] %v767_v1  ;;  %v750_v6 = vmax.f32 %v718_v2, 0.0  ;;  %v766_v7 = vmax.f32 %v734_v3, 0.0  ;;  %v721_v8 = vadd.f32 %v1030_v4, %v1269_v48  ;;  %v737_v9 = vadd.f32 %v1054_v5, %v1269_v48 }
 0x10c   : > { %v511_v10 = vpop.f32.mrf.mxu0  ;;  %v591_v11 = vpop.f32.mrf.mxu1 }
 0x10d   : > { %782 = vst [vmem:[%s1278_s7 + $0x60] sm:$0xff] %v750_v6  ;;  %798 = vst [vmem:[%s1278_s7 + $0xe0] sm:$0xff] %v766_v7  ;;  %v753_v12 = vmax.f32 %v721_v8, 0.0  ;;  %v769_v13 = vmax.f32 %v737_v9, 0.0  ;;  %v720_v14 = vadd.f32 %v1269_v48, %v511_v10  ;;  %v736_v15 = vadd.f32 %v1269_v48, %v591_v11 }
 0x10f   : > { %785 = vst [vmem:[%s1278_s7 + $0x78] sm:$0xff] %v753_v12  ;;  %801 = vst [vmem:[%s1278_s7 + $0xf8] sm:$0xff] %v769_v13  ;;  %v752_v16 = vmax.f32 %v720_v14, 0.0  ;;  %v768_v17 = vmax.f32 %v736_v15, 0.0 }
 0x111   : > { %784 = vst [vmem:[%s1278_s7 + $0x70] sm:$0xff] %v752_v16  ;;  %800 = vst [vmem:[%s1278_s7 + $0xf0] sm:$0xff] %v768_v17 }
 0x112 PF: > { %s13_s14 = sadd.s32 1, %s1133_s14   ;;  %s1355_s12 = smov %s1129_s13 }
 0x113   : > { %p10_p5 = scmp.ge.s32.totalorder %s13_s14, 6   ;;  %s1356_s13 = smov %s1358_s15 }
 0x115   :  { %12 = sbr.rel (!%p10_p5) target bundleno = 2 (0x2), region = 76 }

// kernel: resnet_model_forward.6
= control target key start
LH: loop header
LB: loop body
LE: loop exit
PB: predicated region body
PF: predicated region fallthrough
CT: control target
= control target key end

     0   :  { %s777_s12 = smov 0   ;;  %s779_s13 = smov 0   ;;  %s965_s0 = inlined_call_operand.vmem [shape: f32[16,128], index: 0, kind: input, shape index: {}]   ;;  %s966_s1 = inlined_call_operand.vmem [shape: f32[128,1024], index: 1, kind: input, shape index: {}]   ;;  %s967_s2 = inlined_call_operand.vmem [shape: f32[1,1024], index: 2, kind: input, shape index: {}]   ;;  %s968_s3 = inlined_call_operand.vmem [shape: f32[16,1024], index: 3, kind: output, shape index: {}]  }
   0x1   :  { %s781_s14 = smov 0   ;;  %s783_s15 = smov 0  }
   0x2   :  { %s785_s16 = smov 0  }
   0x3 LB: > { %s28_s17 = sadd.s32 1, %s750_s15  ;;  %s624_s18 = sadd.s32 4294967295, %s754_s16   ;;  %s754_s16 = sphi %s785_s16, %s13_s16   ;;  %s750_s15 = sphi %s783_s15, %s973_s15   ;;  %s746_s14 = sphi %s781_s14, %s972_s14   ;;  %s742_s13 = sphi %s779_s13, %s971_s13   ;;  %s738_s12 = sphi %s777_s12, %s970_s12  }
   0x4   : > { %p30_p0 = scmp.ge.s32.totalorder %s28_s17, 4  ;;  %p76_p1 = scmp.ne.s32.totalorder %s742_s13, %s738_s12 }
   0x5   : > { %p77_p2 = scmp.eq.s32.totalorder %s754_s16, 0  ;;  %p134_p4 = scmp.eq.s32.totalorder %s624_s18, 3 }
   0x6   : > { %s975_s17 = smov (%p30_p0, %s28_s17), 0  ;;  %s69_s20 = sadd.s32 1, %s742_s13 }
   0x7   : > { %p78_p3 = por %p77_p2, %p76_p1  ;;  %s65_s19 = ssub.s32 %s750_s15, %s975_s17 }
   0x8   : > { %p67_p5 = scmp.eq.s32.totalorder %s65_s19, 0  ;;  %p812_p6 = por %p134_p4, %p76_p1 }
   0x9   : > { %p628_p7 = scmp.ge.s32.totalorder %s754_s16, 4 }
   0xa   : > { %s817_s22 = scalar_select %p67_p5, %s742_s13, %s69_s20  }
   0xb   : > { %168 = sbr.rel (%p628_p7) target bundleno = 36 (0x24), region = 20 }
  0x10   : > { %171 = sbr.rel (!%p78_p3) target bundleno = 36 (0x24), region = 24  ;;  %s173_s23 = sand.u32 (%p78_p3), 1, %s742_s13  }
  0x11   : > { %s641_s24 = sshll.u32 (%p78_p3), %s750_s15, 4  ;;  %s629_s25 = sshll.u32 (%p78_p3), %s173_s23, 8 }
  0x12   : > { %s825_s28 = scalar_lea.vmem (%p78_p3), %s966_s1, %s641_s24  ;;  %s830_s29 = scalar_lea.vmem (%p78_p3), [#allocation3], %s629_s25 }
  0x13   : > { %v194_v0 = vld [vmem:[%s825_s28] sm:$0xff] (%p78_p3)  ;;  %v196_v1 = vld [vmem:[%s825_s28 + $0x8] sm:$0xff] (%p78_p3) }
  0x14   : > { %v198_v2 = vld [vmem:[%s825_s28 + $0x40] sm:$0xff] (%p78_p3)  ;;  %195 = vst [vmem:[%s830_s29] sm:$0xff] (%p78_p3), %v194_v0  ;;  %197 = vst [vmem:[%s830_s29 + $0x8] sm:$0xff] (%p78_p3), %v196_v1  ;;  %v200_v3 = vld [vmem:[%s825_s28 + $0x48] sm:$0xff] (%p78_p3) }
  0x15   : > { %199 = vst [vmem:[%s830_s29 + $0x10] sm:$0xff] %v198_v2  ;;  %v202_v4 = vld [vmem:[%s825_s28 + $0x80] sm:$0xff]  ;;  %v204_v5 = vld [vmem:[%s825_s28 + $0x88] sm:$0xff]  ;;  %201 = vst [vmem:[%s830_s29 + $0x18] sm:$0xff] %v200_v3 }
  0x16   : > { %203 = vst [vmem:[%s830_s29 + $0x20] sm:$0xff] %v202_v4  ;;  %205 = vst [vmem:[%s830_s29 + $0x28] sm:$0xff] %v204_v5  ;;  %v206_v6 = vld [vmem:[%s825_s28 + $0xc0] sm:$0xff]  ;;  %v208_v7 = vld [vmem:[%s825_s28 + $0xc8] sm:$0xff] }
  0x17   : > { %v210_v8 = vld [vmem:[%s825_s28 + $0x100] sm:$0xff]  ;;  %207 = vst [vmem:[%s830_s29 + $0x30] sm:$0xff] %v206_v6  ;;  %209 = vst [vmem:[%s830_s29 + $0x38] sm:$0xff] %v208_v7  ;;  %v212_v9 = vld [vmem:[%s825_s28 + $0x108] sm:$0xff] }
  0x18   : > { %211 = vst [vmem:[%s830_s29 + $0x40] sm:$0xff] %v210_v8  ;;  %v214_v10 = vld [vmem:[%s825_s28 + $0x140] sm:$0xff]  ;;  %v216_v11 = vld [vmem:[%s825_s28 + $0x148] sm:$0xff]  ;;  %213 = vst [vmem:[%s830_s29 + $0x48] sm:$0xff] %v212_v9 }
  0x19   : > { %215 = vst [vmem:[%s830_s29 + $0x50] sm:$0xff] %v214_v10  ;;  %217 = vst [vmem:[%s830_s29 + $0x58] sm:$0xff] %v216_v11  ;;  %v218_v12 = vld [vmem:[%s825_s28 + $0x180] sm:$0xff]  ;;  %v220_v13 = vld [vmem:[%s825_s28 + $0x188] sm:$0xff] }
  0x1a   : > { %v222_v14 = vld [vmem:[%s825_s28 + $0x1c0] sm:$0xff]  ;;  %219 = vst [vmem:[%s830_s29 + $0x60] sm:$0xff] %v218_v12  ;;  %221 = vst [vmem:[%s830_s29 + $0x68] sm:$0xff] %v220_v13  ;;  %v224_v15 = vld [vmem:[%s825_s28 + $0x1c8] sm:$0xff] }
  0x1b   : > { %223 = vst [vmem:[%s830_s29 + $0x70] sm:$0xff] %v222_v14  ;;  %v226_v16 = vld [vmem:[%s825_s28 + $0x200] sm:$0xff]  ;;  %v228_v17 = vld [vmem:[%s825_s28 + $0x208] sm:$0xff]  ;;  %225 = vst [vmem:[%s830_s29 + $0x78] sm:$0xff] %v224_v15 }
  0x1c   : > { %227 = vst [vmem:[%s830_s29 + $0x80] sm:$0xff] %v226_v16  ;;  %229 = vst [vmem:[%s830_s29 + $0x88] sm:$0xff] %v228_v17  ;;  %v230_v18 = vld [vmem:[%s825_s28 + $0x240] sm:$0xff]  ;;  %v232_v19 = vld [vmem:[%s825_s28 + $0x248] sm:$0xff] }
  0x1d   : > { %v234_v20 = vld [vmem:[%s825_s28 + $0x280] sm:$0xff]  ;;  %231 = vst [vmem:[%s830_s29 + $0x90] sm:$0xff] %v230_v18  ;;  %233 = vst [vmem:[%s830_s29 + $0x98] sm:$0xff] %v232_v19  ;;  %v236_v21 = vld [vmem:[%s825_s28 + $0x288] sm:$0xff] }
  0x1e   : > { %235 = vst [vmem:[%s830_s29 + $0xa0] sm:$0xff] %v234_v20  ;;  %v238_v22 = vld [vmem:[%s825_s28 + $0x2c0] sm:$0xff]  ;;  %v240_v23 = vld [vmem:[%s825_s28 + $0x2c8] sm:$0xff]  ;;  %237 = vst [vmem:[%s830_s29 + $0xa8] sm:$0xff] %v236_v21 }
  0x1f   : > { %239 = vst [vmem:[%s830_s29 + $0xb0] sm:$0xff] %v238_v22  ;;  %241 = vst [vmem:[%s830_s29 + $0xb8] sm:$0xff] %v240_v23  ;;  %v242_v24 = vld [vmem:[%s825_s28 + $0x300] sm:$0xff]  ;;  %v244_v25 = vld [vmem:[%s825_s28 + $0x308] sm:$0xff] }
  0x20   : > { %v246_v26 = vld [vmem:[%s825_s28 + $0x340] sm:$0xff]  ;;  %243 = vst [vmem:[%s830_s29 + $0xc0] sm:$0xff] %v242_v24  ;;  %245 = vst [vmem:[%s830_s29 + $0xc8] sm:$0xff] %v244_v25  ;;  %v248_v27 = vld [vmem:[%s825_s28 + $0x348] sm:$0xff] }
  0x21   : > { %247 = vst [vmem:[%s830_s29 + $0xd0] sm:$0xff] %v246_v26  ;;  %v250_v28 = vld [vmem:[%s825_s28 + $0x380] sm:$0xff]  ;;  %v252_v29 = vld [vmem:[%s825_s28 + $0x388] sm:$0xff]  ;;  %249 = vst [vmem:[%s830_s29 + $0xd8] sm:$0xff] %v248_v27 }
  0x22   : > { %251 = vst [vmem:[%s830_s29 + $0xe0] sm:$0xff] %v250_v28  ;;  %253 = vst [vmem:[%s830_s29 + $0xe8] sm:$0xff] %v252_v29  ;;  %v254_v30 = vld [vmem:[%s825_s28 + $0x3c0] sm:$0xff]  ;;  %v256_v31 = vld [vmem:[%s825_s28 + $0x3c8] sm:$0xff] }
  0x23   : > { %255 = vst [vmem:[%s830_s29 + $0xf0] sm:$0xff] %v254_v30  ;;  %257 = vst [vmem:[%s830_s29 + $0xf8] sm:$0xff] %v256_v31 }
  0x24 PF: > { %p632_p8 = scmp.ge.s32.totalorder %s754_s16, 1  ;;  %p270_p9 = scmp.lt.s32.totalorder %s754_s16, 5 }
  0x26   : > { %p271_p10 = pnand %p632_p8, %p270_p9 }
  0x27   : > { %s277_s30 = sand.u32 (!%p271_p10), 1, %s738_s12   ;;  %s635_s10 = sshll.u32 (!%p271_p10), %s746_s14, 1 }
  0x28   : > { %274 = sbr.rel (%p271_p10) target bundleno = 285 (0x11d), region = 51  ;;  %s633_s4 = sshll.u32 (!%p271_p10), %s277_s30, 8 }
  0x29   : > { %s898_s5 = scalar_lea.vmem (!%p271_p10), [#allocation3], %s633_s4  ;;  %p323_p11 = scmp.lt.s32.totalorder (!%p271_p10), %s635_s10, 7 }
  0x2a   : > { %s634_s20 = sshll.u32 (!%p271_p10), %s277_s30, 5 }
  0x2b   : > { %s310_s23 = scalar_lea.vmem (!%p271_p10), [#allocation4], %s634_s20 }
  0x2d   : > { %v756_v32 = vmov 0.0   ;;  %v374_v33 = vld [vmem:[%s898_s5 + $0xf8] sm:$0xff]  ;;  %v373_v34 = vld [vmem:[%s898_s5 + $0xf0] sm:$0xff]  ;;  %v372_v35 = vld [vmem:[%s898_s5 + $0xe8] sm:$0xff]  ;;  %v469_v3 = vlaneseq  ;;  %s977_s10 = smov (!%p323_p11, %s635_s10), 7  ;;  %s642_s12 = sshll.u32 (%p812_p6), %s746_s14, 4 }
  0x2e   : > { %439 = vmatprep.mubr.f32.mxu0 %v756_v32  ;;  %445 = vmatprep.mubr.f32.mxu1 %v756_v32  ;;  %v371_v36 = vld [vmem:[%s898_s5 + $0xe0] sm:$0xff]  ;;  %v370_v37 = vld [vmem:[%s898_s5 + $0xd8] sm:$0xff]  ;;  %v369_v38 = vld [vmem:[%s898_s5 + $0xd0] sm:$0xff]  ;;  %s325_s19 = scalar_lea.vmem %s967_s2, %s977_s10  ;;  %s499_s26 = scalar_lea.vmem (%p812_p6), %s968_s3, %s642_s12 }
  0x2f   : > { %375 = vmatprep.subr.mxu0 %v374_v33  ;;  %643 = vmatprep.subr.mxu1 %v374_v33  ;;  %v368_v39 = vld [vmem:[%s898_s5 + $0xc8] sm:$0xff]  ;;  %v367_v40 = vld [vmem:[%s898_s5 + $0xc0] sm:$0xff]  ;;  %v366_v41 = vld [vmem:[%s898_s5 + $0xb8] sm:$0xff]  ;;  %v470_v4 = vshrl.u32 %v469_v3, 7 }
  0x30   : > { %376 = vmatpush1.msra.mxu0 %v373_v34  ;;  %659 = vmatpush1.msra.mxu1 %v373_v34  ;;  %v365_v42 = vld [vmem:[%s898_s5 + $0xb0] sm:$0xff]  ;;  %v364_v43 = vld [vmem:[%s898_s5 + $0xa8] sm:$0xff]  ;;  %v363_v44 = vld [vmem:[%s898_s5 + $0xa0] sm:$0xff] }
  0x31   : > { %377 = vmatprep.subr.mxu0 %v372_v35  ;;  %644 = vmatprep.subr.mxu1 %v372_v35  ;;  %v362_v45 = vld [vmem:[%s898_s5 + $0x98] sm:$0xff]  ;;  %v361_v46 = vld [vmem:[%s898_s5 + $0x90] sm:$0xff]  ;;  %v360_v47 = vld [vmem:[%s898_s5 + $0x88] sm:$0xff]  ;;  %v471_v5 = vsub.s32 0, %v470_v4  ;;  %v475_v7 = vsub.s32 1, %v470_v4 }
  0x32   : > { %378 = vmatpush1.msra.mxu0 %v371_v36  ;;  %660 = vmatpush1.msra.mxu1 %v371_v36  ;;  %v359_v48 = vld [vmem:[%s898_s5 + $0x80] sm:$0xff]  ;;  %v358_v49 = vld [vmem:[%s898_s5 + $0x78] sm:$0xff]  ;;  %v357_v50 = vld [vmem:[%s898_s5 + $0x70] sm:$0xff] }
  0x33   : > { %379 = vmatprep.subr.mxu0 %v370_v37  ;;  %645 = vmatprep.subr.mxu1 %v370_v37  ;;  %v356_v51 = vld [vmem:[%s898_s5 + $0x68] sm:$0xff]  ;;  %v355_v52 = vld [vmem:[%s898_s5 + $0x60] sm:$0xff]  ;;  %v354_v53 = vld [vmem:[%s898_s5 + $0x58] sm:$0xff] }
  0x34   : > { %380 = vmatpush1.msra.mxu0 %v369_v38  ;;  %661 = vmatpush1.msra.mxu1 %v369_v38  ;;  %v353_v54 = vld [vmem:[%s898_s5 + $0x50] sm:$0xff]  ;;  %v352_v55 = vld [vmem:[%s898_s5 + $0x48] sm:$0xff]  ;;  %v351_v56 = vld [vmem:[%s898_s5 + $0x40] sm:$0xff] }
  0x35   : > { %381 = vmatprep.subr.mxu0 %v368_v39  ;;  %646 = vmatprep.subr.mxu1 %v368_v39  ;;  %v350_v57 = vld [vmem:[%s898_s5 + $0x38] sm:$0xff]  ;;  %v349_v58 = vld [vmem:[%s898_s5 + $0x30] sm:$0xff]  ;;  %v348_v59 = vld [vmem:[%s898_s5 + $0x28] sm:$0xff] }
  0x36   : > { %382 = vmatpush1.msra.mxu0 %v367_v40  ;;  %662 = vmatpush1.msra.mxu1 %v367_v40  ;;  %v347_v60 = vld [vmem:[%s898_s5 + $0x20] sm:$0xff]  ;;  %v346_v61 = vld [vmem:[%s898_s5 + $0x18] sm:$0xff]  ;;  %v345_v62 = vld [vmem:[%s898_s5 + $0x10] sm:$0xff] }
  0x37   : > { %383 = vmatprep.subr.mxu0 %v366_v41  ;;  %647 = vmatprep.subr.mxu1 %v366_v41  ;;  %v344_v63 = vld [vmem:[%s898_s5 + $0x8] sm:$0xff]  ;;  %v343_v0 = vld [vmem:[%s898_s5] sm:$0xff] }
  0x38   : > { %384 = vmatpush1.msra.mxu0 %v365_v42  ;;  %663 = vmatpush1.msra.mxu1 %v365_v42  ;;  %v341_v1 = vld [vmem:[%s965_s0] sm:$0xff]  ;;  %v342_v2 = vld [vmem:[%s965_s0 + $0x8] sm:$0xff] }
  0x39   : > { %385 = vmatprep.subr.mxu0 %v364_v43  ;;  %648 = vmatprep.subr.mxu1 %v364_v43  ;;  %v467_v6 = vld [vmem:[%s325_s19] sm:$0x3] }
  0x3a   : > { %386 = vmatpush1.msra.mxu0 %v363_v44  ;;  %664 = vmatpush1.msra.mxu1 %v363_v44  ;;  %v472_v8 = vrot.slane %v467_v6, %v471_v5  ;;  %v476_v9 = vrot.slane %v467_v6, %v475_v7 }
  0x3b   : > { %387 = vmatprep.subr.mxu0 %v362_v45  ;;  %649 = vmatprep.subr.mxu1 %v362_v45 }
  0x3c   : > { %388 = vmatpush1.msra.mxu0 %v361_v46  ;;  %665 = vmatpush1.msra.mxu1 %v361_v46 }
  0x3d   : > { %389 = vmatprep.subr.mxu0 %v360_v47  ;;  %650 = vmatprep.subr.mxu1 %v360_v47 }
  0x3e   : > { %390 = vmatpush1.msra.mxu0 %v359_v48  ;;  %666 = vmatpush1.msra.mxu1 %v359_v48 }
  0x3f   : > { %391 = vmatprep.subr.mxu0 %v358_v49  ;;  %651 = vmatprep.subr.mxu1 %v358_v49 }
  0x40   : > { %392 = vmatpush1.msra.mxu0 %v357_v50  ;;  %667 = vmatpush1.msra.mxu1 %v357_v50 }
  0x41   : > { %393 = vmatprep.subr.mxu0 %v356_v51  ;;  %652 = vmatprep.subr.mxu1 %v356_v51 }
  0x42   : > { %394 = vmatpush1.msra.mxu0 %v355_v52  ;;  %668 = vmatpush1.msra.mxu1 %v355_v52 }
  0x43   : > { %395 = vmatprep.subr.mxu0 %v354_v53  ;;  %653 = vmatprep.subr.mxu1 %v354_v53 }
  0x44   : > { %396 = vmatpush1.msra.mxu0 %v353_v54  ;;  %669 = vmatpush1.msra.mxu1 %v353_v54 }
  0x45   : > { %397 = vmatprep.subr.mxu0 %v352_v55  ;;  %654 = vmatprep.subr.mxu1 %v352_v55 }
  0x46   : > { %398 = vmatpush1.msra.mxu0 %v351_v56  ;;  %670 = vmatpush1.msra.mxu1 %v351_v56 }
  0x47   : > { %399 = vmatprep.subr.mxu0 %v350_v57  ;;  %655 = vmatprep.subr.mxu1 %v350_v57 }
  0x48   : > { %400 = vmatpush1.msra.mxu0 %v349_v58  ;;  %671 = vmatpush1.msra.mxu1 %v349_v58 }
  0x49   : > { %401 = vmatprep.subr.mxu0 %v348_v59  ;;  %656 = vmatprep.subr.mxu1 %v348_v59 }
  0x4a   : > { %402 = vmatpush1.msra.mxu0 %v347_v60  ;;  %672 = vmatpush1.msra.mxu1 %v347_v60 }
  0x4b   : > { %403 = vmatprep.subr.mxu0 %v346_v61  ;;  %657 = vmatprep.subr.mxu1 %v346_v61 }
  0x4c   : > { %404 = vmatpush1.msra.mxu0 %v345_v62  ;;  %673 = vmatpush1.msra.mxu1 %v345_v62 }
  0x4d   : > { %405 = vmatprep.subr.mxu0 %v344_v63  ;;  %658 = vmatprep.subr.mxu1 %v344_v63 }
  0x4e   : > { %406 = vmatpush1.msra.mxu0 %v343_v0  ;;  %674 = vmatpush1.msra.mxu1 %v343_v0 }
  0x4f   : > { %440 = vmatmul.mubr.f32.vlgmr.msra.gmra.mxu0 %v341_v1  ;;  %446 = vmatmul.mubr.f32.vlgmr.msra.gmra.mxu1 %v342_v2 }
 0x10f   : > { %v441_v10 = vpop.f32.mrf.mxu0  ;;  %v447_v11 = vpop.f32.mrf.mxu1 }
 0x110   : > { %v479_v12 = vadd.f32 %v472_v8, %v441_v10  ;;  %v481_v13 = vadd.f32 %v472_v8, %v447_v11  ;;  %493 = sbr.rel (!%p812_p6) target bundleno = 285 (0x11d), region = 67 }
 0x111   : > { %v443_v14 = vpop.f32.mrf.mxu0  ;;  %v449_v15 = vpop.f32.mrf.mxu1 }
 0x112   : > { %483 = vst [vmem:[%s310_s23] sm:$0xff] %v479_v12  ;;  %485 = vst [vmem:[%s310_s23 + $0x10] sm:$0xff] %v481_v13  ;;  %v480_v16 = vadd.f32 %v476_v9, %v443_v14  ;;  %v482_v17 = vadd.f32 %v476_v9, %v449_v15 }
 0x114   : > { %484 = vst [vmem:[%s310_s23 + $0x8] sm:$0xff] %v480_v16  ;;  %486 = vst [vmem:[%s310_s23 + $0x18] sm:$0xff] %v482_v17 }
 0x119   : > { %v512_v18 = vld [vmem:[%s310_s23] sm:$0xff]  ;;  %v516_v20 = vld [vmem:[%s310_s23 + $0x10] sm:$0xff] }
 0x11a   : > { %513 = vst [vmem:[%s499_s26] sm:$0xff] %v512_v18  ;;  %517 = vst [vmem:[%s499_s26 + $0x40] sm:$0xff] %v516_v20 }
 0x11b   : > { %v514_v19 = vld [vmem:[%s310_s23 + $0x8] sm:$0xff]  ;;  %v518_v21 = vld [vmem:[%s310_s23 + $0x18] sm:$0xff] }
 0x11c   : > { %515 = vst [vmem:[%s499_s26 + $0x8] sm:$0xff] %v514_v19  ;;  %519 = vst [vmem:[%s499_s26 + $0x48] sm:$0xff] %v518_v21 }
 0x11d PF: > { %s13_s16 = sadd.s32 1, %s754_s16   ;;  %s970_s12 = smov %s742_s13 }
 0x11e   : > { %p10_p12 = scmp.ge.s32.totalorder %s13_s16, 6   ;;  %s971_s13 = smov %s817_s22 }
 0x11f   : > { %s972_s14 = smov %s750_s15  ;;  %s973_s15 = smov %s975_s17 }
 0x120   :  { %12 = sbr.rel (!%p10_p12) target bundleno = 3 (0x3), region = 127 }

// kernel: resnet_model_forward.7
= control target key start
LH: loop header
LB: loop body
LE: loop exit
PB: predicated region body
PF: predicated region fallthrough
CT: control target
= control target key end

     0   :  { %s1254_s12 = smov 0   ;;  %s1256_s13 = smov 0   ;;  %s1408_s0 = inlined_call_operand.vmem [shape: bf16[16,1024], index: 0, kind: input, shape index: {}]   ;;  %s1409_s1 = inlined_call_operand.vmem [shape: bf16[1024,256], index: 1, kind: input, shape index: {}]   ;;  %s1410_s2 = inlined_call_operand.vmem [shape: f32[1,256], index: 2, kind: input, shape index: {}]   ;;  %s1411_s3 = inlined_call_operand.vmem [shape: f32[16,256], index: 3, kind: output, shape index: {}]  }
   0x1   :  { %s1258_s14 = smov 0   ;;  %s1260_s15 = smov 0  }
   0x2   :  { %s1262_s16 = smov 0  }
   0x3 LB: > { %s25_s17 = sadd.s32 1, %s1227_s15  ;;  %p48_p1 = scmp.ne.s32.totalorder %s1219_s13, %s1215_s12  ;;  %s1231_s16 = sphi %s1262_s16, %s13_s16   ;;  %s1227_s15 = sphi %s1260_s15, %s1415_s15   ;;  %s1223_s14 = sphi %s1258_s14, %s1414_s14   ;;  %s1219_s13 = sphi %s1256_s13, %s1413_s13   ;;  %s1215_s12 = sphi %s1254_s12, %s1412_s12  }
   0x4   : > { %p26_p0 = scmp.ge.s32.totalorder %s25_s17, 2  ;;  %p49_p2 = scmp.eq.s32.totalorder %s1231_s16, 0 }
   0x5   : > { %s41_s19 = sadd.s32 1, %s1219_s13  ;;  %p965_p5 = scmp.ge.s32.totalorder %s1231_s16, 2 }
   0x6   : > { %s1417_s17 = smov (%p26_p0, %s25_s17), 0  ;;  %p50_p3 = por %p49_p2, %p48_p1 }
   0x7   : > { %s37_s18 = ssub.s32 %s1227_s15, %s1417_s17  ;;  %164 = sbr.rel (%p965_p5) target bundleno = 18 (0x12), region = 20 }
   0x8   : > { %p39_p4 = scmp.eq.s32.totalorder %s37_s18, 0 }
   0xa   : > { %s1289_s20 = scalar_select %p39_p4, %s1219_s13, %s41_s19  }
   0xc   : > { %167 = sbr.rel (!%p50_p3) target bundleno = 18 (0x12), region = 24  ;;  %s169_s21 = sand.u32 (%p50_p3), 1, %s1219_s13  }
   0xd   : > { %s1048_s22 = sshll.u32 (%p50_p3), %s1227_s15, 4  ;;  %s966_s23 = sshll.u32 (%p50_p3), %s169_s21, 5 }
   0xe   : > { %s177_s26 = scalar_lea.vmem (%p50_p3), %s1408_s0, %s1048_s22  ;;  %s171_s27 = scalar_lea.vmem (%p50_p3), [#allocation3], %s966_s23 }
   0xf   : > { %v190_v0 = vld [vmem:[%s177_s26] sm:$0xff] (%p50_p3)  ;;  %v192_v1 = vld [vmem:[%s177_s26 + $0x8] sm:$0xff] (%p50_p3) }
  0x10   : > { %v194_v2 = vld [vmem:[%s177_s26 + $0x20] sm:$0xff] (%p50_p3)  ;;  %191 = vst [vmem:[%s171_s27] sm:$0xff] (%p50_p3), %v190_v0  ;;  %193 = vst [vmem:[%s171_s27 + $0x8] sm:$0xff] (%p50_p3), %v192_v1  ;;  %v196_v3 = vld [vmem:[%s177_s26 + $0x28] sm:$0xff] (%p50_p3) }
  0x11   : > { %195 = vst [vmem:[%s171_s27 + $0x10] sm:$0xff] %v194_v2  ;;  %197 = vst [vmem:[%s171_s27 + $0x18] sm:$0xff] %v196_v3 }
  0x12 PF: > { %p969_p6 = scmp.ge.s32.totalorder %s1231_s16, 1  ;;  %p217_p7 = scmp.lt.s32.totalorder %s1231_s16, 3 }
  0x14   : > { %p218_p8 = pnand %p969_p6, %p217_p7 }
  0x15   : > { %s224_s28 = sand.u32 (!%p218_p8), 1, %s1215_s12   ;;  %s971_s29 = sshll.u32 (!%p218_p8), %s1223_s14, 6 }
  0x16   : > { %221 = sbr.rel (%p218_p8) target bundleno = 317 (0x13d), region = 51  ;;  %s970_s30 = sshll.u32 (!%p218_p8), %s224_s28, 5 }
  0x17   : > { %p270_p9 = scmp.lt.s32.totalorder (!%p218_p8), %s971_s29, 127  ;;  %s1306_s8 = scalar_lea.vmem (!%p218_p8), [#allocation3], %s970_s30 }
  0x18   : > { %p974_p10 = scmp.ne.s32.totalorder (!%p218_p8), %s1223_s14, 0 }
  0x1b   : > { %s1419_s29 = smov (!%p270_p9, %s971_s29), 127  ;;  %300 = sbr.rel (%p974_p10) target bundleno = 35 (0x23), region = 59 }
  0x1c   : > { %s1049_s4 = sshll.u32 %s1419_s29, 3 }
  0x1d   : > { %s1304_s7 = scalar_lea.vmem %s1409_s1, %s1049_s4 }
  0x20   : > { %v1233_v4 = vmov 0.0  }
  0x21   : > { %301 = vst [vmem:[#allocation2 + $0x10] sm:$0xff] %v1233_v4  ;;  %302 = vst [vmem:[#allocation2] sm:$0xff] %v1233_v4 }
  0x22   : > { %303 = vst [vmem:[#allocation2 + $0x18] sm:$0xff] %v1233_v4  ;;  %304 = vst [vmem:[#allocation2 + $0x8] sm:$0xff] %v1233_v4 }
  0x23 PF: > { %v1091_v5 = vld [vmem:[%s1304_s7 + $0x74] ss:$8 sps:$4 sm:$0xff]   ;;  %v1095_v7 = vld [vmem:[%s1304_s7 + $0x70] ss:$8 sps:$4 sm:$0xff]   ;;  %v1097_v9 = vld [vmem:[%s1304_s7 + $0x64] ss:$8 sps:$4 sm:$0xff]  }
  0x24   : > { %v1093_v6 = vld [vmem:[%s1304_s7 + $0x174] ss:$8 sps:$4 sm:$0xff]   ;;  %717 = vmatprep.subr.bf16.mxu0 %v1091_v5  ;;  %v1096_v8 = vld [vmem:[%s1304_s7 + $0x170] ss:$8 sps:$4 sm:$0xff]   ;;  %v1099_v10 = vld [vmem:[%s1304_s7 + $0x164] ss:$8 sps:$4 sm:$0xff]  }
  0x25   : > { %760 = vmatprep.subr.bf16.mxu1 %v1093_v6  ;;  %718 = vmatpush1.bf16.msra.mxu0 %v1095_v7  ;;  %v1101_v11 = vld [vmem:[%s1304_s7 + $0x60] ss:$8 sps:$4 sm:$0xff]   ;;  %v1103_v13 = vld [vmem:[%s1304_s7 + $0x54] ss:$8 sps:$4 sm:$0xff]   ;;  %v1107_v15 = vld [vmem:[%s1304_s7 + $0x50] ss:$8 sps:$4 sm:$0xff]  }
  0x26   : > { %761 = vmatpush1.bf16.msra.mxu1 %v1096_v8  ;;  %719 = vmatprep.subr.bf16.mxu0 %v1097_v9  ;;  %v1102_v12 = vld [vmem:[%s1304_s7 + $0x160] ss:$8 sps:$4 sm:$0xff]   ;;  %v1105_v14 = vld [vmem:[%s1304_s7 + $0x154] ss:$8 sps:$4 sm:$0xff]   ;;  %v1108_v16 = vld [vmem:[%s1304_s7 + $0x150] ss:$8 sps:$4 sm:$0xff]  }
  0x27   : > { %762 = vmatprep.subr.bf16.mxu1 %v1099_v10  ;;  %v1109_v17 = vld [vmem:[%s1304_s7 + $0x44] ss:$8 sps:$4 sm:$0xff]   ;;  %v1113_v19 = vld [vmem:[%s1304_s7 + $0x40] ss:$8 sps:$4 sm:$0xff]   ;;  %v1115_v21 = vld [vmem:[%s1304_s7 + $0x34] ss:$8 sps:$4 sm:$0xff]  }
  0x28   : > { %v1111_v18 = vld [vmem:[%s1304_s7 + $0x144] ss:$8 sps:$4 sm:$0xff]   ;;  %v1114_v20 = vld [vmem:[%s1304_s7 + $0x140] ss:$8 sps:$4 sm:$0xff]   ;;  %v1117_v22 = vld [vmem:[%s1304_s7 + $0x134] ss:$8 sps:$4 sm:$0xff]  }
  0x29   : > { %720 = vmatpush1.bf16.msra.mxu0 %v1101_v11  ;;  %v1119_v23 = vld [vmem:[%s1304_s7 + $0x30] ss:$8 sps:$4 sm:$0xff]   ;;  %v1121_v25 = vld [vmem:[%s1304_s7 + $0x24] ss:$8 sps:$4 sm:$0xff]   ;;  %v1125_v27 = vld [vmem:[%s1304_s7 + $0x20] ss:$8 sps:$4 sm:$0xff]  }
  0x2a   : > { %763 = vmatpush1.bf16.msra.mxu1 %v1102_v12  ;;  %721 = vmatprep.subr.bf16.mxu0 %v1103_v13  ;;  %v1120_v24 = vld [vmem:[%s1304_s7 + $0x130] ss:$8 sps:$4 sm:$0xff]   ;;  %v1123_v26 = vld [vmem:[%s1304_s7 + $0x124] ss:$8 sps:$4 sm:$0xff]   ;;  %v1126_v28 = vld [vmem:[%s1304_s7 + $0x120] ss:$8 sps:$4 sm:$0xff]  }
  0x2b   : > { %764 = vmatprep.subr.bf16.mxu1 %v1105_v14  ;;  %v1127_v29 = vld [vmem:[%s1304_s7 + $0x14] ss:$8 sps:$4 sm:$0xff]   ;;  %v1131_v31 = vld [vmem:[%s1304_s7 + $0x10] ss:$8 sps:$4 sm:$0xff]   ;;  %v1133_v33 = vld [vmem:[%s1304_s7 + $0x4] ss:$8 sps:$4 sm:$0xff]  }
  0x2c   : > { %v1129_v30 = vld [vmem:[%s1304_s7 + $0x114] ss:$8 sps:$4 sm:$0xff]   ;;  %v1132_v32 = vld [vmem:[%s1304_s7 + $0x110] ss:$8 sps:$4 sm:$0xff]   ;;  %v1135_v34 = vld [vmem:[%s1304_s7 + $0x104] ss:$8 sps:$4 sm:$0xff]  }
  0x2d   : > { %722 = vmatpush1.bf16.msra.mxu0 %v1107_v15  ;;  %v1137_v35 = vld [vmem:[%s1304_s7] ss:$8 sps:$4 sm:$0xff]   ;;  %v1139_v37 = vld [vmem:[%s1304_s7 + $0xf4] ss:$8 sps:$4 sm:$0xff]   ;;  %v1143_v39 = vld [vmem:[%s1304_s7 + $0xf0] ss:$8 sps:$4 sm:$0xff]  }
  0x2e   : > { %765 = vmatpush1.bf16.msra.mxu1 %v1108_v16  ;;  %723 = vmatprep.subr.bf16.mxu0 %v1109_v17  ;;  %v1138_v36 = vld [vmem:[%s1304_s7 + $0x100] ss:$8 sps:$4 sm:$0xff]   ;;  %v1141_v38 = vld [vmem:[%s1304_s7 + $0x1f4] ss:$8 sps:$4 sm:$0xff]   ;;  %v1144_v40 = vld [vmem:[%s1304_s7 + $0x1f0] ss:$8 sps:$4 sm:$0xff]  }
  0x2f   : > { %766 = vmatprep.subr.bf16.mxu1 %v1111_v18  ;;  %v1145_v41 = vld [vmem:[%s1304_s7 + $0xe4] ss:$8 sps:$4 sm:$0xff]   ;;  %v1149_v43 = vld [vmem:[%s1304_s7 + $0xe0] ss:$8 sps:$4 sm:$0xff]   ;;  %v1151_v45 = vld [vmem:[%s1304_s7 + $0xd4] ss:$8 sps:$4 sm:$0xff]  }
  0x30   : > { %v1147_v42 = vld [vmem:[%s1304_s7 + $0x1e4] ss:$8 sps:$4 sm:$0xff]   ;;  %v1150_v44 = vld [vmem:[%s1304_s7 + $0x1e0] ss:$8 sps:$4 sm:$0xff]   ;;  %v1153_v46 = vld [vmem:[%s1304_s7 + $0x1d4] ss:$8 sps:$4 sm:$0xff]  }
  0x31   : > { %724 = vmatpush1.bf16.msra.mxu0 %v1113_v19  ;;  %v1155_v47 = vld [vmem:[%s1304_s7 + $0xd0] ss:$8 sps:$4 sm:$0xff]   ;;  %v1157_v49 = vld [vmem:[%s1304_s7 + $0xc4] ss:$8 sps:$4 sm:$0xff]   ;;  %v1161_v51 = vld [vmem:[%s1304_s7 + $0xc0] ss:$8 sps:$4 sm:$0xff]  }
  0x32   : > { %767 = vmatpush1.bf16.msra.mxu1 %v1114_v20  ;;  %725 = vmatprep.subr.bf16.mxu0 %v1115_v21  ;;  %v1156_v48 = vld [vmem:[%s1304_s7 + $0x1d0] ss:$8 sps:$4 sm:$0xff]   ;;  %v1159_v50 = vld [vmem:[%s1304_s7 + $0x1c4] ss:$8 sps:$4 sm:$0xff]   ;;  %v1162_v53 = vld [vmem:[%s1304_s7 + $0x1c0] ss:$8 sps:$4 sm:$0xff]  }
  0x33   : > { %768 = vmatprep.subr.bf16.mxu1 %v1117_v22  ;;  %v1189_v52 = vld [vmem:[%s1306_s8 + $0x4] ss:$16 sps:$4 sm:$0xff]   ;;  %v1192_v56 = vld [vmem:[%s1306_s8 + $0xc] ss:$16 sps:$4 sm:$0xff]   ;;  %v1167_v57 = vld [vmem:[%s1304_s7 + $0xb0] ss:$8 sps:$4 sm:$0xff]  }
  0x34   : > { %v1163_v54 = vld [vmem:[%s1304_s7 + $0xb4] ss:$8 sps:$4 sm:$0xff]   ;;  %749 = vmatprep.mubr.bf16.mxu0 %v1189_v52  ;;  %792 = vmatprep.mubr.bf16.mxu1 %v1192_v56  ;;  %v1168_v58 = vld [vmem:[%s1304_s7 + $0x1b0] ss:$8 sps:$4 sm:$0xff]   ;;  %v1169_v59 = vld [vmem:[%s1304_s7 + $0xa4] ss:$8 sps:$4 sm:$0xff]  }
  0x35   : > { %726 = vmatpush1.bf16.msra.mxu0 %v1119_v23  ;;  %v1165_v55 = vld [vmem:[%s1304_s7 + $0x1b4] ss:$8 sps:$4 sm:$0xff]   ;;  %v1171_v60 = vld [vmem:[%s1304_s7 + $0x1a4] ss:$8 sps:$4 sm:$0xff]   ;;  %v1173_v61 = vld [vmem:[%s1304_s7 + $0xa0] ss:$8 sps:$4 sm:$0xff]  }
  0x36   : > { %769 = vmatpush1.bf16.msra.mxu1 %v1120_v24  ;;  %727 = vmatprep.subr.bf16.mxu0 %v1121_v25  ;;  %v1174_v62 = vld [vmem:[%s1304_s7 + $0x1a0] ss:$8 sps:$4 sm:$0xff]   ;;  %v1175_v63 = vld [vmem:[%s1304_s7 + $0x94] ss:$8 sps:$4 sm:$0xff]   ;;  %v1179_v1 = vld [vmem:[%s1304_s7 + $0x90] ss:$8 sps:$4 sm:$0xff]  }
  0x37   : > { %770 = vmatprep.subr.bf16.mxu1 %v1123_v26  ;;  %v1177_v0 = vld [vmem:[%s1304_s7 + $0x194] ss:$8 sps:$4 sm:$0xff]   ;;  %v1180_v2 = vld [vmem:[%s1304_s7 + $0x190] ss:$8 sps:$4 sm:$0xff]   ;;  %v1181_v3 = vld [vmem:[%s1304_s7 + $0x84] ss:$8 sps:$4 sm:$0xff]  }
  0x38   : > { %v1183_v4 = vld [vmem:[%s1304_s7 + $0x184] ss:$8 sps:$4 sm:$0xff]   ;;  %v1185_v5 = vld [vmem:[%s1304_s7 + $0x80] ss:$8 sps:$4 sm:$0xff]   ;;  %v305_v10 = vld [vmem:[#allocation2 + $0x10] sm:$0xff]  ;;  %p1043_p11 = scmp.ne.s32.totalorder %s1223_s14, 1 }
  0x39   : > { %728 = vmatpush1.bf16.msra.mxu0 %v1125_v27  ;;  %v1186_v6 = vld [vmem:[%s1304_s7 + $0x180] ss:$8 sps:$4 sm:$0xff]   ;;  %v307_v19 = vld [vmem:[#allocation2 + $0x18] sm:$0xff] }
  0x3a   : > { %771 = vmatpush1.bf16.msra.mxu1 %v1126_v28  ;;  %729 = vmatprep.subr.bf16.mxu0 %v1127_v29  ;;  %v1187_v7 = vld [vmem:[%s1306_s8] ss:$16 sps:$4 sm:$0xff]   ;;  %v1190_v8 = vld [vmem:[%s1306_s8 + $0x8] ss:$16 sps:$4 sm:$0xff]  }
  0x3b   : > { %772 = vmatprep.subr.bf16.mxu1 %v1129_v30  ;;  %v306_v14 = vld [vmem:[#allocation2] sm:$0xff]  ;;  %v308_v24 = vld [vmem:[#allocation2 + $0x8] sm:$0xff] }
  0x3d   : > { %730 = vmatpush1.bf16.msra.mxu0 %v1131_v31 }
  0x3e   : > { %773 = vmatpush1.bf16.msra.mxu1 %v1132_v32  ;;  %731 = vmatprep.subr.bf16.mxu0 %v1133_v33 }
  0x3f   : > { %774 = vmatprep.subr.bf16.mxu1 %v1135_v34 }
  0x41   : > { %732 = vmatpush1.bf16.msra.mxu0 %v1137_v35 }
  0x42   : > { %775 = vmatpush1.bf16.msra.mxu1 %v1138_v36  ;;  %733 = vmatprep.subr.bf16.mxu0 %v1139_v37 }
  0x43   : > { %776 = vmatprep.subr.bf16.mxu1 %v1141_v38 }
  0x45   : > { %734 = vmatpush2.bf16.msra.mxu0 %v1143_v39 }
  0x46   : > { %777 = vmatpush2.bf16.msra.mxu1 %v1144_v40  ;;  %735 = vmatprep.subr.bf16.mxu0 %v1145_v41 }
  0x47   : > { %778 = vmatprep.subr.bf16.mxu1 %v1147_v42 }
  0x49   : > { %736 = vmatpush2.bf16.msra.mxu0 %v1149_v43 }
  0x4a   : > { %779 = vmatpush2.bf16.msra.mxu1 %v1150_v44  ;;  %737 = vmatprep.subr.bf16.mxu0 %v1151_v45 }
  0x4b   : > { %780 = vmatprep.subr.bf16.mxu1 %v1153_v46 }
  0x4d   : > { %738 = vmatpush2.bf16.msra.mxu0 %v1155_v47 }
  0x4e   : > { %781 = vmatpush2.bf16.msra.mxu1 %v1156_v48  ;;  %739 = vmatprep.subr.bf16.mxu0 %v1157_v49 }
  0x4f   : > { %782 = vmatprep.subr.bf16.mxu1 %v1159_v50 }
  0x51   : > { %740 = vmatpush2.bf16.msra.mxu0 %v1161_v51 }
  0x52   : > { %783 = vmatpush2.bf16.msra.mxu1 %v1162_v53  ;;  %741 = vmatprep.subr.bf16.mxu0 %v1163_v54 }
  0x53   : > { %784 = vmatprep.subr.bf16.mxu1 %v1165_v55 }
  0x55   : > { %742 = vmatpush2.bf16.msra.mxu0 %v1167_v57 }
  0x56   : > { %785 = vmatpush2.bf16.msra.mxu1 %v1168_v58  ;;  %743 = vmatprep.subr.bf16.mxu0 %v1169_v59 }
  0x57   : > { %786 = vmatprep.subr.bf16.mxu1 %v1171_v60 }
  0x59   : > { %744 = vmatpush2.bf16.msra.mxu0 %v1173_v61 }
  0x5a   : > { %787 = vmatpush2.bf16.msra.mxu1 %v1174_v62  ;;  %745 = vmatprep.subr.bf16.mxu0 %v1175_v63 }
  0x5b   : > { %788 = vmatprep.subr.bf16.mxu1 %v1177_v0 }
  0x5d   : > { %746 = vmatpush2.bf16.msra.mxu0 %v1179_v1 }
  0x5e   : > { %789 = vmatpush2.bf16.msra.mxu1 %v1180_v2  ;;  %747 = vmatprep.subr.bf16.mxu0 %v1181_v3 }
  0x5f   : > { %790 = vmatprep.subr.bf16.mxu1 %v1183_v4 }
  0x61   : > { %748 = vmatpush2.bf16.msra.mxu0 %v1185_v5 }
  0x62   : > { %791 = vmatpush2.bf16.msra.mxu1 %v1186_v6 }
  0x64   : > { %750 = vmatmul.mubr.bf16.vlgmr.msra.gmra.mxu0 %v1187_v7 }
  0x65   : > { %793 = vmatmul.mubr.bf16.vlgmr.msra.gmra.mxu1 %v1190_v8 }
 0x124   : > { %v751_v9 = vpop.f32.mrf.mxu0 }
 0x125   : > { %v794_v11 = vpop.f32.mrf.mxu1 }
 0x126   : > { %v795_v12 = vadd.f32 %v794_v11, %v751_v9  ;;  %v753_v13 = vpop.f32.mrf.mxu0 }
 0x127   : > { %v796_v15 = vpop.f32.mrf.mxu1 }
 0x128   : > { %v803_v16 = vadd.f32 %v795_v12, %v305_v10  ;;  %v797_v17 = vadd.f32 %v796_v15, %v753_v13  ;;  %v755_v18 = vpop.f32.mrf.mxu0 }
 0x129   : > { %v798_v20 = vpop.f32.mrf.mxu1 }
 0x12a   : > { %807 = vst [vmem:[#allocation2 + $0x10] sm:$0xff] %v803_v16  ;;  %v804_v21 = vadd.f32 %v797_v17, %v306_v14  ;;  %v799_v22 = vadd.f32 %v798_v20, %v755_v18  ;;  %v757_v23 = vpop.f32.mrf.mxu0 }
 0x12b   : > { %v800_v25 = vpop.f32.mrf.mxu1 }
 0x12c   : > { %808 = vst [vmem:[#allocation2] sm:$0xff] %v804_v21  ;;  %v805_v26 = vadd.f32 %v799_v22, %v307_v19  ;;  %v801_v27 = vadd.f32 %v800_v25, %v757_v23  ;;  %814 = sbr.rel (%p1043_p11) target bundleno = 317 (0x13d), region = 63 }
 0x12e   : > { %809 = vst [vmem:[#allocation2 + $0x18] sm:$0xff] %v805_v26  ;;  %v806_v28 = vadd.f32 %v801_v27, %v308_v24 }
 0x130   : > { %810 = vst [vmem:[#allocation2 + $0x8] sm:$0xff] %v806_v28 }
 0x131   : > { %v821_v29 = vlaneseq  ;;  %v819_v31 = vld [vmem:[%s1410_s2] sm:$0x3]  ;;  %v815_v32 = vld [vmem:[#allocation2 + $0x10] sm:$0xff] }
 0x133   : > { %v822_v30 = vshrl.u32 %v821_v29, 7  ;;  %v816_v35 = vld [vmem:[#allocation2] sm:$0xff] }
 0x135   : > { %v823_v33 = vsub.s32 0, %v822_v30  ;;  %v827_v34 = vsub.s32 1, %v822_v30  ;;  %v817_v36 = vld [vmem:[#allocation2 + $0x18] sm:$0xff] }
 0x137   : > { %v818_v37 = vld [vmem:[#allocation2 + $0x8] sm:$0xff]  ;;  %v824_v38 = vrot.slane %v819_v31, %v823_v33  ;;  %v828_v39 = vrot.slane %v819_v31, %v827_v34 }
 0x139   : > { %v831_v40 = vadd.f32 %v824_v38, %v815_v32  ;;  %v832_v41 = vadd.f32 %v828_v39, %v816_v35  ;;  %v833_v42 = vadd.f32 %v824_v38, %v817_v36  ;;  %v834_v43 = vadd.f32 %v828_v39, %v818_v37 }
 0x13b   : > { %835 = vst [vmem:[%s1411_s3] sm:$0xff] %v831_v40  ;;  %836 = vst [vmem:[%s1411_s3 + $0x8] sm:$0xff] %v832_v41 }
 0x13c   : > { %837 = vst [vmem:[%s1411_s3 + $0x10] sm:$0xff] %v833_v42  ;;  %838 = vst [vmem:[%s1411_s3 + $0x18] sm:$0xff] %v834_v43 }
 0x13d PF: > { %s13_s16 = sadd.s32 1, %s1231_s16   ;;  %s1412_s12 = smov %s1219_s13 }
 0x13e   : > { %p10_p12 = scmp.ge.s32.totalorder %s13_s16, 4   ;;  %s1413_s13 = smov %s1289_s20 }
 0x13f   : > { %s1414_s14 = smov %s1227_s15  ;;  %s1415_s15 = smov %s1417_s17 }
 0x140   :  { %12 = sbr.rel (!%p10_p12) target bundleno = 3 (0x3), region = 104 }

// kernel: resnet_model_forward.8
= control target key start
LH: loop header
LB: loop body
LE: loop exit
PB: predicated region body
PF: predicated region fallthrough
CT: control target
= control target key end

     0   :  { %v257_v0 = vmov 0.0   ;;  %s259_s12 = smov 0   ;;  %s336_s0 = inlined_call_operand.vmem [shape: f32[8,2,192], index: 0, kind: input, shape index: {}]   ;;  %s337_s1 = inlined_call_operand.vmem [shape: f32[64,192], index: 1, kind: input, shape index: {}]   ;;  %s338_s2 = inlined_call_operand.vmem [shape: f32[1,192], index: 2, kind: input, shape index: {}]   ;;  %s339_s3 = inlined_call_operand.vmem [shape: f32[8,2,64], index: 3, kind: output, shape index: {}]  }
   0x1 LB: > { %v43_v1 = vlaneseq  ;;  %v40_v2 = vld [vmem:[%s337_s1 + $0x78] sm:$0xff]  ;;  %v39_v3 = vld [vmem:[%s337_s1 + $0x70] sm:$0xff]  ;;  %v38_v4 = vld [vmem:[%s337_s1 + $0x68] sm:$0xff]  ;;  %v234_v5 = vmov 1983009808   ;;  %v235_v10 = vmov 0.0   ;;  %s232_s12 = sphi %s259_s12, %s19_s12   ;;  %v228_v0 = vphi %v257_v0, %v157_v0  }
   0x2   : > { %v55_v6 = vunpack.c.l.s4 %v234_v5  ;;  %82 = vmatprep.subr.mxu0 %v40_v2  ;;  %v37_v7 = vld [vmem:[%s337_s1 + $0x60] sm:$0xff]  ;;  %v36_v9 = vld [vmem:[%s337_s1 + $0x58] sm:$0xff]  ;;  %130 = vmatprep.mubr.f32.mxu0 %v235_v10  ;;  %v35_v12 = vld [vmem:[%s337_s1 + $0x50] sm:$0xff]  ;;  %s236_s8 = smov 64   ;;  %vm63_vm0 = vcmask 523264   ;;  %s192_s20 = sshll.u32 %s232_s12, 2 }
   0x3   : > { %v44_v8 = vshrl.u32 %v43_v1, 7  ;;  %83 = vmatpush1.msra.mxu0 %v39_v3  ;;  %v34_v13 = vld [vmem:[%s337_s1 + $0x48] sm:$0xff]  ;;  %v33_v15 = vld [vmem:[%s337_s1 + $0x40] sm:$0xff]  ;;  %v32_v16 = vld [vmem:[%s337_s1 + $0x38] sm:$0xff]  ;;  %s23_s25 = scalar_lea.vmem %s336_s0, %s192_s20  ;;  %s188_s26 = sshll.u32 %s232_s12, 1  ;;  %vm170_vm1 = vcmask 517120  }
   0x4   : > { %v56_v11 = vunpack.c.0.s8 %v55_v6  ;;  %84 = vmatprep.subr.mxu0 %v38_v4  ;;  %v31_v18 = vld [vmem:[%s337_s1 + $0x30] sm:$0xff]  ;;  %v30_v19 = vld [vmem:[%s337_s1 + $0x28] sm:$0xff]  ;;  %v29_v20 = vld [vmem:[%s337_s1 + $0x20] sm:$0xff]  ;;  %s169_s29 = scalar_lea.vmem %s339_s3, %s188_s26  ;;  %s19_s12 = sadd.s32 1, %s232_s12  }
   0x5   : > { %85 = vmatpush1.msra.mxu0 %v37_v7  ;;  %v28_v21 = vld [vmem:[%s337_s1 + $0x18] sm:$0xff]  ;;  %v27_v22 = vld [vmem:[%s337_s1 + $0x10] sm:$0xff]  ;;  %v26_v23 = vld [vmem:[%s337_s1 + $0x8] sm:$0xff]  ;;  %v45_v26 = vsub.s32 0, %v44_v8  ;;  %v49_v36 = vsub.s32 1, %v44_v8  ;;  %p16_p0 = scmp.ge.s32.totalorder %s19_s12, 8  }
   0x6   : > { %v59_v14 = vsub.s32 %v56_v11, %v44_v8  ;;  %86 = vmatprep.subr.mxu0 %v36_v9  ;;  %v25_v24 = vld [vmem:[%s337_s1] sm:$0xff] }
   0x7   : > { %87 = vmatpush1.msra.mxu0 %v35_v12  ;;  %v41_v27 = vld [vmem:[%s338_s2] sm:$0x3] }
   0x8   : > { %v60_v17 = vrot.slane %v228_v0, %v59_v14  ;;  %88 = vmatprep.subr.mxu0 %v34_v13  ;;  %v46_v28 = vrot.slane %v41_v27, %v45_v26  ;;  %v24_v29 = vld [vmem:[%s23_s25] sm:$0xf]  ;;  %v50_v37 = vrot.slane %v41_v27, %v49_v36 }
   0x9   : > { %89 = vmatpush1.msra.mxu0 %v33_v15  ;;  %v146_v39 = vrot.slane %v24_v29, 2 }
   0xa   : > { %61 = vrot.lane.b32.xlu0 %v60_v17, %s236_s8  ;;  %90 = vmatprep.subr.mxu0 %v32_v16 }
   0xb   : > { %91 = vmatpush1.msra.mxu0 %v31_v18 }
   0xc   : > { %92 = vmatprep.subr.mxu0 %v30_v19 }
   0xd   : > { %93 = vmatpush1.msra.mxu0 %v29_v20 }
   0xe   : > { %94 = vmatprep.subr.mxu0 %v28_v21 }
   0xf   : > { %95 = vmatpush1.msra.mxu0 %v27_v22 }
  0x10   : > { %96 = vmatprep.subr.mxu0 %v26_v23 }
  0x11   : > { %97 = vmatpush1.msra.mxu0 %v25_v24 }
  0x7c   : > { %v62_v25 = vpop.permute.xlu0 %61 }
  0x7d   : > { %190 = vmatmul.mubr.msk.f32.vlgmr.msra.gmra.mxu0 %vm63_vm0, %v62_v25 }
 0x13d   : > { %v132_v30 = vpop.f32.mrf.mxu0 }
 0x13e   : > { %v133_v31 = vadd.f32 %v132_v30, %v46_v28 }
 0x13f   : > { %v134_v38 = vpop.f32.mrf.mxu0 }
 0x140   : > { %v137_v32 = vadd.f32 %v133_v31, %v24_v29  ;;  %v135_v40 = vadd.f32 %v134_v38, %v50_v37 }
 0x142   : > { %v191_v33 = vmul.f32 -1.442695, %v137_v32 }
 0x144   : > { %212 = vpow2.f32 %v191_v33 }
 0x151   : > { %v213_v34 = vpop.eup %212 }
 0x152   : > { %v141_v35 = vadd.f32 1.0, %v213_v34 }
 0x154   : > { %214 = vrcp.f32 %v141_v35 }
 0x161   : > { %v215_v41 = vpop.eup %214 }
 0x162   : > { %v144_v42 = vmul.f32 %v215_v41, %v135_v40  ;;  %v150_v45 = vsub.f32 1.0, %v215_v41  ;;  %v156_v47 = vmul.f32 %v228_v0, %v215_v41 }
 0x164   : > { %v148_v43 = vadd.f32 %v146_v39, %v144_v42 }
 0x166   : > { %216 = vtanh.f32 %v148_v43 }
 0x173   : > { %v217_v44 = vpop.eup %216 }
 0x174   : > { %152 = vrot.lane.b32.xlu0 %v217_v44, %s236_s8 }
 0x1e6   : > { %v153_v46 = vpop.permute.xlu0 %152 }
 0x1e7   : > { %v155_v48 = vmul.f32 %v153_v46, %v150_v45 }
 0x1e9   : > { %v157_v0 = vadd.f32 %v156_v47, %v155_v48  }
 0x1eb   : > { %v165_v49 = vrot.slane %v157_v0, %v59_v14 }
 0x1ed   : > { %166 = vrot.lane.b32.xlu1 %v165_v49, %s236_s8 }
 0x25c   :  { %18 = sbr.rel (!%p16_p0) target bundleno = 1 (0x1), region = 41 }
 0x25f   : > { %v167_v50 = vpop.permute.xlu1 %166 }
 0x260   : > { %171 = vst.msk [vmem:[%s169_s29] sm:$0x3] %vm170_vm1, %v167_v50 }

// kernel: resnet_model_forward.9
= control target key start
LH: loop header
LB: loop body
LE: loop exit
PB: predicated region body
PF: predicated region fallthrough
CT: control target
= control target key end

     0   :  { %s298_s1 = inlined_call_operand.vmem [shape: f32[128,128], index: 1, kind: input, shape index: {}]   ;;  %s299_s0 = inlined_call_operand.vmem [shape: f32[16,128], index: 0, kind: input, shape index: {}]   ;;  %s300_s2 = inlined_call_operand.vmem [shape: f32[1,128], index: 2, kind: input, shape index: {}]   ;;  %s301_s3 = inlined_call_operand.vmem [shape: f32[16,128], index: 3, kind: output, shape index: {}]  }
   0x1   :  { %v39_v0 = vld [vmem:[%s298_s1 + $0x78] sm:$0xff]  ;;  %v38_v1 = vld [vmem:[%s298_s1 + $0x70] sm:$0xff]  ;;  %v37_v2 = vld [vmem:[%s298_s1 + $0x68] sm:$0xff] }
   0x2   :  { %176 = vmatprep.subr.mxu0 %v39_v0  ;;  %v36_v3 = vld [vmem:[%s298_s1 + $0x60] sm:$0xff]  ;;  %v35_v5 = vld [vmem:[%s298_s1 + $0x58] sm:$0xff]  ;;  %v34_v6 = vld [vmem:[%s298_s1 + $0x50] sm:$0xff] }
   0x3   :  { %177 = vmatpush3.msra.mxu0 %v39_v0  ;;  %v22_v4 = vld [vmem:[%s299_s0] sm:$0xff]  ;;  %v33_v7 = vld [vmem:[%s298_s1 + $0x48] sm:$0xff]  ;;  %v31_v9 = vld [vmem:[%s298_s1 + $0x38] sm:$0xff] }
   0x4   :  { %178 = vmatprep.subr.mxu0 %v38_v1  ;;  %208 = vmatprep.mubr.f32.mxu0 %v22_v4  ;;  %v32_v8 = vld [vmem:[%s298_s1 + $0x40] sm:$0xff]  ;;  %v30_v10 = vld [vmem:[%s298_s1 + $0x30] sm:$0xff]  ;;  %v29_v11 = vld [vmem:[%s298_s1 + $0x28] sm:$0xff] }
   0x5   :  { %179 = vmatpush3.msra.mxu0 %v38_v1  ;;  %v28_v12 = vld [vmem:[%s298_s1 + $0x20] sm:$0xff]  ;;  %v27_v13 = vld [vmem:[%s298_s1 + $0x18] sm:$0xff]  ;;  %v26_v14 = vld [vmem:[%s298_s1 + $0x10] sm:$0xff] }
   0x6   :  { %180 = vmatprep.subr.mxu0 %v37_v2  ;;  %v25_v15 = vld [vmem:[%s298_s1 + $0x8] sm:$0xff]  ;;  %v24_v16 = vld [vmem:[%s298_s1] sm:$0xff] }
   0x7   :  { %181 = vmatpush3.msra.mxu0 %v37_v2  ;;  %v23_v17 = vld [vmem:[%s299_s0 + $0x8] sm:$0xff]  ;;  %v157_v18 = vld [vmem:[%s300_s2] ss:$0 sm:$0xff] }
   0x8   :  { %182 = vmatprep.subr.mxu0 %v36_v3 }
   0x9   :  { %183 = vmatpush3.msra.mxu0 %v36_v3 }
   0xa   :  { %184 = vmatprep.subr.mxu0 %v35_v5 }
   0xb   :  { %185 = vmatpush3.msra.mxu0 %v35_v5 }
   0xc   :  { %186 = vmatprep.subr.mxu0 %v34_v6 }
   0xd   :  { %187 = vmatpush3.msra.mxu0 %v34_v6 }
   0xe   :  { %188 = vmatprep.subr.mxu0 %v33_v7 }
   0xf   :  { %189 = vmatpush3.msra.mxu0 %v33_v7 }
  0x10   :  { %190 = vmatprep.subr.mxu0 %v32_v8 }
  0x11   :  { %191 = vmatpush3.msra.mxu0 %v32_v8 }
  0x12   :  { %192 = vmatprep.subr.mxu0 %v31_v9 }
  0x13   :  { %193 = vmatpush3.msra.mxu0 %v31_v9 }
  0x14   :  { %194 = vmatprep.subr.mxu0 %v30_v10 }
  0x15   :  { %195 = vmatpush3.msra.mxu0 %v30_v10 }
  0x16   :  { %196 = vmatprep.subr.mxu0 %v29_v11 }
  0x17   :  { %197 = vmatpush3.msra.mxu0 %v29_v11 }
  0x18   :  { %198 = vmatprep.subr.mxu0 %v28_v12 }
  0x19   :  { %199 = vmatpush3.msra.mxu0 %v28_v12 }
  0x1a   :  { %200 = vmatprep.subr.mxu0 %v27_v13 }
  0x1b   :  { %201 = vmatpush3.msra.mxu0 %v27_v13 }
  0x1c   :  { %202 = vmatprep.subr.mxu0 %v26_v14 }
  0x1d   :  { %203 = vmatpush3.msra.mxu0 %v26_v14 }
  0x1e   :  { %204 = vmatprep.subr.mxu0 %v25_v15 }
  0x1f   :  { %205 = vmatpush3.msra.mxu0 %v25_v15 }
  0x20   :  { %206 = vmatprep.subr.mxu0 %v24_v16 }
  0x21   :  { %207 = vmatpush3.msra.mxu0 %v24_v16 }
  0x22   :  { %209 = vmatmul.mubr.f32.vlgmr.msra.gmra.mxu0 %v23_v17 }
  0xe2   :  { %v210_v19 = vpop.f32.mrf.mxu0 }
  0xe3   :  { %v132_v20 = vadd.f32 %v210_v19, %v157_v18 }
  0xe4   :  { %v106_v21 = vpop.f32.mrf.mxu0 }
  0xe5   :  { %v136_v22 = vmul.f32 0.044715, %v132_v20  ;;  %v131_v23 = vadd.f32 %v157_v18, %v106_v21  ;;  %v134_v34 = vmul.f32 0.5, %v132_v20 }
  0xe7   :  { %v138_v24 = vmul.f32 %v136_v22, %v132_v20  ;;  %v135_v25 = vmul.f32 0.044715, %v131_v23  ;;  %v133_v38 = vmul.f32 0.5, %v131_v23 }
  0xe9   :  { %v140_v26 = vmul.f32 %v138_v24, %v132_v20  ;;  %v137_v27 = vmul.f32 %v135_v25, %v131_v23 }
  0xeb   :  { %v142_v28 = vadd.f32 %v140_v26, %v132_v20  ;;  %v139_v29 = vmul.f32 %v137_v27, %v131_v23 }
  0xed   :  { %v144_v30 = vmul.f32 0.7978846, %v142_v28  ;;  %v141_v31 = vadd.f32 %v139_v29, %v131_v23 }
  0xef   :  { %211 = vtanh.f32 %v144_v30  ;;  %v143_v32 = vmul.f32 0.7978846, %v141_v31 }
  0xf1   :  { %213 = vtanh.f32 %v143_v32 }
  0xfc   :  { %v212_v33 = vpop.eup %211 }
  0xfd   :  { %v148_v35 = vadd.f32 1.0, %v212_v33 }
  0xfe   :  { %v214_v36 = vpop.eup %213 }
  0xff   :  { %v150_v37 = vmul.f32 %v148_v35, %v134_v34  ;;  %v147_v39 = vadd.f32 1.0, %v214_v36 }
 0x101   :  { %152 = vst [vmem:[%s301_s3 + $0x8] sm:$0xff] %v150_v37  ;;  %v149_v40 = vmul.f32 %v147_v39, %v133_v38 }
 0x103   :  { %151 = vst [vmem:[%s301_s3] sm:$0xff] %v149_v40 }

</bundles_post_ra>
